<compile_context>
chip_gen: v7x
topology: tpu7x:2x2x1
jax: 0.10.0
libtpu: 0.0.40
codegen_flags: <defaults>
</compile_context>

<pallas_src>
import functools

import jax
import jax.numpy as jnp
from jax import lax
from jax.experimental import pallas as pl
from jax.experimental.pallas import tpu as pltpu

_MIB = 1024 * 1024


# --------------------------------------------------------------------------- #
# Kernels
# --------------------------------------------------------------------------- #
def _linattn_whole_kernel(x_ref, wq_ref, wk_ref, wv_ref, wout_ref, bout_ref,
                          mask_ref, o_ref, *, softmax_dtype):
    # x_ref    : (C, N)            f32  (batch dim squeezed by BlockSpec)
    # wq/wk/wv : (hidden, C)       bf16
    # wout     : (C, hidden)       bf16
    # bout     : (C, 1)            f32
    # mask     : (hidden, hidden)  f32  block-diagonal head mask (hoisted constant)
    # o_ref    : (C, N)            f32
    x = x_ref[...]
    if x.dtype != jnp.bfloat16:
        x = x.astype(jnp.bfloat16)

    # Three separate projections; each result cast to bf16 as produced (only k
    # stays f32 for the softmax max/exp path).
    q = jnp.dot(wq_ref[...], x, preferred_element_type=jnp.float32).astype(jnp.bfloat16)
    v = jnp.dot(wv_ref[...], x, preferred_element_type=jnp.float32).astype(jnp.bfloat16)
    k = jnp.dot(wk_ref[...], x, preferred_element_type=jnp.float32)      # (hidden, N)

    # Un-normalized softmax numerator over the spatial (lane) axis; the 1/sum
    # normalization is folded into the (hidden, hidden) context tile below.
    kmax = jnp.max(k, axis=1, keepdims=True)
    p = jnp.exp((k - kmax).astype(softmax_dtype))
    ksum = jnp.sum(p, axis=1, keepdims=True, dtype=jnp.float32)          # (hidden, 1)
    pb = p.astype(jnp.bfloat16)

    # ctx[h*D+d, h'*D+e] = sum_n exp(k)[h*D+d, n] * v[h'*D+e, n]
    ctx = lax.dot_general(pb, v, (((1,), (1,)), ((), ())),
                          preferred_element_type=jnp.float32)            # (hidden, hidden)

    # Fused: softmax denominator (per k-row) + block-diagonal head mask + bf16 cast,
    # all on the tiny (hidden, hidden) tile.  f32 transpose so the second matmul is
    # a plain (non-transposed-lhs) MXU dot.
    scale = mask_ref[...] * pl.reciprocal(ksum, approx=True)
    ctx_b = jnp.transpose(ctx * scale).astype(jnp.bfloat16)              # (v-rows, k-cols)

    # out[h*D+e, n] = sum_d ctx[h, d, e] * q[h, d, n]   (all heads at once)
    out = jnp.dot(ctx_b, q, preferred_element_type=jnp.float32)          # (hidden, N)

    y = jnp.dot(wout_ref[...], out.astype(jnp.bfloat16),
                preferred_element_type=jnp.float32) + bout_ref[...]
    o_ref[...] = y.astype(o_ref.dtype)


def _linattn_ctx_kernel(x_ref, wk_ref, wv_ref, mask_ref, ctx_ref,
                        m_sc, l_sc, acc_sc, *, softmax_dtype):
    """Pass 1 of the N-tiled path: online-softmax accumulation of the context."""
    t = pl.program_id(1)

    @pl.when(t == 0)
    def _():
        m_sc[...] = jnp.full_like(m_sc, -jnp.inf)
        l_sc[...] = jnp.zeros_like(l_sc)
        acc_sc[...] = jnp.zeros_like(acc_sc)

    x = x_ref[...]
    if x.dtype != jnp.bfloat16:
        x = x.astype(jnp.bfloat16)
    k = jnp.dot(wk_ref[...], x, preferred_element_type=jnp.float32)      # (hidden, Tn)
    v = jnp.dot(wv_ref[...], x, preferred_element_type=jnp.float32).astype(jnp.bfloat16)

    m_prev = m_sc[...]
    m_new = jnp.maximum(m_prev, jnp.max(k, axis=1, keepdims=True))
    alpha = jnp.exp(m_prev - m_new)                                      # (hidden, 1)
    p = jnp.exp((k - m_new).astype(softmax_dtype))
    l_sc[...] = alpha * l_sc[...] + jnp.sum(p, axis=1, keepdims=True, dtype=jnp.float32)
    acc_sc[...] = alpha * acc_sc[...] + lax.dot_general(
        p.astype(jnp.bfloat16), v, (((1,), (1,)), ((), ())),
        preferred_element_type=jnp.float32)
    m_sc[...] = m_new

    @pl.when(t == pl.num_programs(1) - 1)
    def _():
        scale = mask_ref[...] * pl.reciprocal(l_sc[...], approx=True)
        # Store already-transposed & normalized & masked context (bf16) for pass 2.
        ctx_ref[...] = jnp.transpose(acc_sc[...] * scale).astype(ctx_ref.dtype)


def _linattn_out_kernel(ctx_ref, x_ref, wq_ref, wout_ref, bout_ref, o_ref):
    """Pass 2 of the N-tiled path: recompute q per tile and emit output tiles."""
    x = x_ref[...]
    if x.dtype != jnp.bfloat16:
        x = x.astype(jnp.bfloat16)
    q = jnp.dot(wq_ref[...], x, preferred_element_type=jnp.float32).astype(jnp.bfloat16)
    out = jnp.dot(ctx_ref[...], q, preferred_element_type=jnp.float32)   # (hidden, Tn)
    y = jnp.dot(wout_ref[...], out.astype(jnp.bfloat16),
                preferred_element_type=jnp.float32) + bout_ref[...]
    o_ref[...] = y.astype(o_ref.dtype)


# --------------------------------------------------------------------------- #
# Wrapper
# --------------------------------------------------------------------------- #
def _device_caps():
    """Return (physical VMEM bytes, whether bf16 VPU/EUP elementwise is profitable)."""
    vmem_bytes = 64 * _MIB                      # conservative default (v7x per-TC)
    try:
        vmem_bytes = int(pltpu.get_tpu_info().vmem_capacity_bytes)
    except Exception:
        pass
    kind = ""
    try:
        kind = jax.devices()[0].device_kind.lower()
    except Exception:
        pass
    # v2-v5 have no bf16 VPU/EUP path; v6e / v7x (and newer/unknown parts) do.
    old_gen = any(tag in kind for tag in ("v2", "v3", "v4", "v5"))
    return vmem_bytes, (not old_gen)


def _pick_tile_n(n, max_tile=2048):
    """Largest multiple of 128 that divides n and is <= max_tile (0 if none)."""
    if n % 128 != 0:
        return 0
    t = min(max_tile, n)
    t -= t % 128
    while t >= 128:
        if n % t == 0:
            return t
        t -= 128
    return 0


def linear_attention(x_nchw, w_qkv, w_out, b_out, *, heads, dim_head,
                     force_path=None, tile_n=None):
    """Pallas implementation of LinearAttention.forward.

    x_nchw : (B, C, H, W) float32
    w_qkv  : (3*heads*dim_head, C, 1, 1)   -- Conv2d(dim, hidden*3, 1, bias=False)
    w_out  : (C, heads*dim_head, 1, 1)     -- Conv2d(hidden, dim, 1)
    b_out  : (C,)
    force_path : None | "whole" | "tiled"  (None = auto by VMEM budget)
    """
    b, c, h, w = x_nchw.shape
    n = h * w
    hidden = heads * dim_head

    # Glue: pure reshapes / tiny weight slices+casts (no extra HBM passes over x).
    x = x_nchw.reshape(b, c, n)                                          # (B, C, N)
    wqkv_mat = w_qkv.reshape(3 * hidden, c).astype(jnp.bfloat16)
    wq = wqkv_mat[0 * hidden:1 * hidden]                                 # (hidden, C)
    wk = wqkv_mat[1 * hidden:2 * hidden]
    wv = wqkv_mat[2 * hidden:3 * hidden]
    wout_mat = w_out.reshape(c, hidden).astype(jnp.bfloat16)             # (C, hidden)
    bout2d = b_out.reshape(c, 1).astype(jnp.float32)                     # (C, 1)

    # Hoisted constant block-diagonal head mask (heads must not mix).
    head_id = jnp.arange(hidden, dtype=jnp.int32) // dim_head
    mask = (head_id[:, None] == head_id[None, :]).astype(jnp.float32)    # (hidden, hidden)

    vmem_bytes, bf16_elem = _device_caps()
    softmax_dtype = jnp.bfloat16 if bf16_elem else jnp.float32
    vmem_cap = min(int(0.75 * vmem_bytes), 100 * _MIB)                   # gen-aware cap

    # Per-grid-step VMEM estimate for the whole-N kernel (with margin).
    est_whole = (2 * 2 * c * n * 4                                       # x + y, dbl-buffered
                 + 2 * (3 * hidden * c * 2 + c * hidden * 2
                        + hidden * hidden * 4 + c * 4)                   # weights + mask + bias
                 + hidden * n * (22 if bf16_elem else 26)                # q/k/v/p/out slabs
                 + c * n * 8 + hidden * hidden * 16)

    if force_path is None:
        use_whole = est_whole <= vmem_cap
    else:
        use_whole = (force_path == "whole")

    tn = 0
    if not use_whole:
        tn = tile_n if tile_n is not None else _pick_tile_n(n)
        if tn == 0 or n % tn != 0:
            # TODO(synk): ragged N (not a multiple of 128) needs a masked softmax tail
            # in the tiled path; fall back to the whole-N kernel for such shapes.
            use_whole = True

    if use_whole:
        kernel = functools.partial(_linattn_whole_kernel, softmax_dtype=softmax_dtype)
        vmem_limit = int(min(max(int(1.5 * est_whole), 32 * _MIB), vmem_cap))
        out = pl.pallas_call(
            kernel,
            out_shape=jax.ShapeDtypeStruct((b, c, n), jnp.float32),
            grid_spec=pltpu.PrefetchScalarGridSpec(
                num_scalar_prefetch=0,
                grid=(b,),
                in_specs=[
                    pl.BlockSpec((None, c, n), lambda i: (i, 0, 0)),     # x (C, N), lane-dense
                    pl.BlockSpec((hidden, c), lambda i: (0, 0)),         # wq
                    pl.BlockSpec((hidden, c), lambda i: (0, 0)),         # wk
                    pl.BlockSpec((hidden, c), lambda i: (0, 0)),         # wv
                    pl.BlockSpec((c, hidden), lambda i: (0, 0)),         # wout
                    pl.BlockSpec((c, 1), lambda i: (0, 0)),              # bias
                    pl.BlockSpec((hidden, hidden), lambda i: (0, 0)),    # head mask
                ],
                out_specs=pl.BlockSpec((None, c, n), lambda i: (i, 0, 0)),
            ),
            compiler_params=pltpu.CompilerParams(
                dimension_semantics=("parallel",),
                vmem_limit_bytes=vmem_limit),
        )(x, wq, wk, wv, wout_mat, bout2d, mask)
        return out.reshape(b, c, h, w)

    # ---- Flash-style N-tiled two-pass path (large feature maps / v7x VMEM) ----
    nt = n // tn
    est_tiled = (2 * 2 * c * tn * 4
                 + 2 * (3 * hidden * c * 2 + c * hidden * 2
                        + hidden * hidden * 6 + c * 4)
                 + hidden * tn * (22 if bf16_elem else 26)
                 + c * tn * 8 + hidden * hidden * 24)
    vmem_limit_t = int(min(max(int(1.5 * est_tiled), 32 * _MIB), vmem_cap))

    # Pass 1: accumulate normalized, masked, transposed context per batch element.
    ctx = pl.pallas_call(
        functools.partial(_linattn_ctx_kernel, softmax_dtype=softmax_dtype),
        out_shape=jax.ShapeDtypeStruct((b, hidden, hidden), jnp.bfloat16),
        grid_spec=pltpu.PrefetchScalarGridSpec(
            num_scalar_prefetch=0,
            grid=(b, nt),
            in_specs=[
                pl.BlockSpec((None, c, tn), lambda i, t: (i, 0, t)),     # x tile
                pl.BlockSpec((hidden, c), lambda i, t: (0, 0)),          # wk
                pl.BlockSpec((hidden, c), lambda i, t: (0, 0)),          # wv
                pl.BlockSpec((hidden, hidden), lambda i, t: (0, 0)),     # head mask
            ],
            out_specs=pl.BlockSpec((None, hidden, hidden), lambda i, t: (i, 0, 0)),
            scratch_shapes=[
                pltpu.VMEM((hidden, 1), jnp.float32),                    # running max
                pltpu.VMEM((hidden, 1), jnp.float32),                    # running exp-sum
                pltpu.VMEM((hidden, hidden), jnp.float32),               # ctx accumulator
            ]),
        compiler_params=pltpu.CompilerParams(
            dimension_semantics=("parallel", "arbitrary"),
            vmem_limit_bytes=vmem_limit_t),
    )(x, wk, wv, mask)

    # Pass 2: recompute q per tile (cheap, C-deep) and emit (C, Tn) output tiles.
    out = pl.pallas_call(
        _linattn_out_kernel,
        out_shape=jax.ShapeDtypeStruct((b, c, n), jnp.float32),
        grid_spec=pltpu.PrefetchScalarGridSpec(
            num_scalar_prefetch=0,
            grid=(b, nt),
            in_specs=[
                pl.BlockSpec((None, hidden, hidden), lambda i, t: (i, 0, 0)),  # ctx
                pl.BlockSpec((None, c, tn), lambda i, t: (i, 0, t)),           # x tile
                pl.BlockSpec((hidden, c), lambda i, t: (0, 0)),                # wq
                pl.BlockSpec((c, hidden), lambda i, t: (0, 0)),                # wout
                pl.BlockSpec((c, 1), lambda i, t: (0, 0)),                     # bias
            ],
            out_specs=pl.BlockSpec((None, c, tn), lambda i, t: (i, 0, t)),
        ),
        compiler_params=pltpu.CompilerParams(
            dimension_semantics=("parallel", "parallel"),   # both v7x TCs get work
            vmem_limit_bytes=vmem_limit_t),
    )(ctx, x, wq, wout_mat, bout2d)

    return out.reshape(b, c, h, w)


# --------------------------------------------------------------------------- #
# Pure-JAX reference (mirrors the PyTorch module exactly, f32)
# --------------------------------------------------------------------------- #
def _reference_forward(x_nchw, w_qkv, w_out, b_out, *, heads, dim_head):
    b, c, hh, ww = x_nchw.shape
    hidden = heads * dim_head
    n = hh * ww
    x = x_nchw.reshape(b, c, n)
    qkv = jnp.einsum('oc,bcn->bon', w_qkv.reshape(3 * hidden, c), x)
    qkv = qkv.reshape(b, 3, heads, dim_head, n)
    q, k, v = qkv[:, 0], qkv[:, 1], qkv[:, 2]
    k = jax.nn.softmax(k, axis=-1)
    context = jnp.einsum('bhdn,bhen->bhde', k, v)
    out = jnp.einsum('bhde,bhdn->bhen', context, q)
    out = out.reshape(b, hidden, n)
    y = jnp.einsum('oc,bcn->bon', w_out.reshape(c, hidden), out)
    y = y + b_out[None, :, None]
    return y.reshape(b, c, hh, ww)


if __name__ == "__main__":
    # LinearAttention(dim=4, heads=4, dim_head=32); input (2, 4, 16, 16)
    B, DIM, H, W = 2, 4, 16, 16
    HEADS, DIM_HEAD = 4, 32
    HIDDEN = HEADS * DIM_HEAD

    key = jax.random.PRNGKey(0)
    kx, kq, kw, kb = jax.random.split(key, 4)
    x = jax.random.normal(kx, (B, DIM, H, W), dtype=jnp.float32)
    w_qkv = jax.random.normal(kq, (3 * HIDDEN, DIM, 1, 1), dtype=jnp.float32) * 0.1
    w_out = jax.random.normal(kw, (DIM, HIDDEN, 1, 1), dtype=jnp.float32) * 0.1
    b_out = jax.random.normal(kb, (DIM,), dtype=jnp.float32) * 0.1

    y_ref = _reference_forward(x, w_qkv, w_out, b_out, heads=HEADS, dim_head=DIM_HEAD)

    # Whole-N single-kernel path.
    y = linear_attention(x, w_qkv, w_out, b_out, heads=HEADS, dim_head=DIM_HEAD,
                         force_path="whole")
    y = jax.block_until_ready(y)
    assert y.shape == (B, DIM, H, W)
    assert jnp.allclose(y, y_ref, atol=2e-2, rtol=2e-2), "whole-N path mismatch"

    # Flash-style N-tiled two-pass path, exercised explicitly with a small tile.
    y_t = linear_attention(x, w_qkv, w_out, b_out, heads=HEADS, dim_head=DIM_HEAD,
                           force_path="tiled", tile_n=128)
    y_t = jax.block_until_ready(y_t)
    assert jnp.allclose(y_t, y_ref, atol=2e-2, rtol=2e-2), "tiled path mismatch"

    # Auto path selection (picks whole-N at this size).
    y_a = linear_attention(x, w_qkv, w_out, b_out, heads=HEADS, dim_head=DIM_HEAD)
    y_a = jax.block_until_ready(y_a)
    assert jnp.allclose(y_a, y_ref, atol=2e-2, rtol=2e-2), "auto path mismatch"

    print("KERNEL_OK")
</pallas_src>

<mosaic_0001>
module attributes {stable_mosaic.version = 11 : i64} {
  func.func @_linattn_whole_kernel(%arg0: i32, %arg1: memref<1x4x256xf32, #tpu.memory_space<vmem>>, %arg2: memref<128x4xbf16, #tpu.memory_space<vmem>>, %arg3: memref<128x4xbf16, #tpu.memory_space<vmem>>, %arg4: memref<128x4xbf16, #tpu.memory_space<vmem>>, %arg5: memref<4x128xbf16, #tpu.memory_space<vmem>>, %arg6: memref<4x1xf32, #tpu.memory_space<vmem>>, %arg7: memref<128x128xf32, #tpu.memory_space<vmem>>, %arg8: memref<1x4x256xf32, #tpu.memory_space<vmem>>) attributes {dimension_semantics = [#tpu.dimension_semantics<parallel>], iteration_bounds = array<i64: 2>, scalar_prefetch = 0 : i64, scratch_operands = 0 : i64, tpu.core_type = #tpu.core_type<tc>, window_params = [{transform_indices = @transform_0, window_bounds = array<i64: 1, 4, 256>}, {pipeline_mode = #tpu.pipeline_mode<synchronous>, transform_indices = @transform_1, window_bounds = array<i64: 128, 4>}, {pipeline_mode = #tpu.pipeline_mode<synchronous>, transform_indices = @transform_2, window_bounds = array<i64: 128, 4>}, {pipeline_mode = #tpu.pipeline_mode<synchronous>, transform_indices = @transform_3, window_bounds = array<i64: 128, 4>}, {pipeline_mode = #tpu.pipeline_mode<synchronous>, transform_indices = @transform_4, window_bounds = array<i64: 4, 128>}, {pipeline_mode = #tpu.pipeline_mode<synchronous>, transform_indices = @transform_5, window_bounds = array<i64: 4, 1>}, {pipeline_mode = #tpu.pipeline_mode<synchronous>, transform_indices = @transform_6, window_bounds = array<i64: 128, 128>}, {transform_indices = @transform_7, window_bounds = array<i64: 1, 4, 256>}]} {
    %c0 = arith.constant 0 : index
    %c0_0 = arith.constant 0 : index
    %c0_1 = arith.constant 0 : index
    %0 = vector.load %arg1[%c0, %c0_0, %c0_1] : memref<1x4x256xf32, #tpu.memory_space<vmem>>, vector<1x4x256xf32>
    %1 = vector.shape_cast %0 : vector<1x4x256xf32> to vector<4x256xf32>
    %2 = arith.truncf %1 : vector<4x256xf32> to vector<4x256xbf16>
    %c0_2 = arith.constant 0 : index
    %c0_3 = arith.constant 0 : index
    %3 = vector.load %arg2[%c0_2, %c0_3] : memref<128x4xbf16, #tpu.memory_space<vmem>>, vector<128x4xbf16>
    %cst = arith.constant dense<0.000000e+00> : vector<128x256xf32>
    %4 = tpu.matmul %3, %2, %cst {dimension_numbers = #tpu.dot_dimension_numbers<[1], [0], [0], [1], [0, 0, 1, 1], [], []>} : vector<128x4xbf16>, vector<4x256xbf16>, vector<128x256xf32> -> vector<128x256xf32>
    %5 = arith.truncf %4 : vector<128x256xf32> to vector<128x256xbf16>
    %c0_4 = arith.constant 0 : index
    %c0_5 = arith.constant 0 : index
    %6 = vector.load %arg4[%c0_4, %c0_5] : memref<128x4xbf16, #tpu.memory_space<vmem>>, vector<128x4xbf16>
    %cst_6 = arith.constant dense<0.000000e+00> : vector<128x256xf32>
    %7 = tpu.matmul %6, %2, %cst_6 {dimension_numbers = #tpu.dot_dimension_numbers<[1], [0], [0], [1], [0, 0, 1, 1], [], []>} : vector<128x4xbf16>, vector<4x256xbf16>, vector<128x256xf32> -> vector<128x256xf32>
    %8 = arith.truncf %7 : vector<128x256xf32> to vector<128x256xbf16>
    %c0_7 = arith.constant 0 : index
    %c0_8 = arith.constant 0 : index
    %9 = vector.load %arg3[%c0_7, %c0_8] : memref<128x4xbf16, #tpu.memory_space<vmem>>, vector<128x4xbf16>
    %cst_9 = arith.constant dense<0.000000e+00> : vector<128x256xf32>
    %10 = tpu.matmul %9, %2, %cst_9 {dimension_numbers = #tpu.dot_dimension_numbers<[1], [0], [0], [1], [0, 0, 1, 1], [], []>} : vector<128x4xbf16>, vector<4x256xbf16>, vector<128x256xf32> -> vector<128x256xf32>
    %cst_10 = arith.constant dense<0xFF800000> : vector<128xf32>
    %11 = vector.multi_reduction <maximumf>, %10, %cst_10 [1] : vector<128x256xf32> to vector<128xf32>
    %12 = vector.shape_cast %11 : vector<128xf32> to vector<128x1xf32>
    %13 = vector.broadcast %12 : vector<128x1xf32> to vector<128x256xf32>
    %14 = arith.subf %10, %13 : vector<128x256xf32>
    %15 = arith.truncf %14 : vector<128x256xf32> to vector<128x256xbf16>
    %16 = math.exp %15 : vector<128x256xbf16>
    %17 = arith.extf %16 : vector<128x256xbf16> to vector<128x256xf32>
    %cst_11 = arith.constant dense<0.000000e+00> : vector<128xf32>
    %18 = vector.multi_reduction <add>, %17, %cst_11 [1] : vector<128x256xf32> to vector<128xf32>
    %19 = vector.shape_cast %18 : vector<128xf32> to vector<128x1xf32>
    %cst_12 = arith.constant dense<0.000000e+00> : vector<128x128xf32>
    %20 = tpu.matmul %16, %8, %cst_12 {dimension_numbers = #tpu.dot_dimension_numbers<[1], [1], [0], [0], [0, 0, 1, 0], [], []>} : vector<128x256xbf16>, vector<128x256xbf16>, vector<128x128xf32> -> vector<128x128xf32>
    %c0_13 = arith.constant 0 : index
    %c0_14 = arith.constant 0 : index
    %21 = vector.load %arg7[%c0_13, %c0_14] : memref<128x128xf32, #tpu.memory_space<vmem>>, vector<128x128xf32>
    %22 = tpu.reciprocal %19 {approx = true} : vector<128x1xf32> -> vector<128x1xf32>
    %23 = vector.broadcast %22 : vector<128x1xf32> to vector<128x128xf32>
    %24 = arith.mulf %21, %23 : vector<128x128xf32>
    %25 = arith.mulf %20, %24 : vector<128x128xf32>
    %26 = tpu.transpose %25, [1, 0] : vector<128x128xf32> -> vector<128x128xf32>
    %27 = arith.truncf %26 : vector<128x128xf32> to vector<128x128xbf16>
    %cst_15 = arith.constant dense<0.000000e+00> : vector<128x256xf32>
    %28 = tpu.matmul %27, %5, %cst_15 {dimension_numbers = #tpu.dot_dimension_numbers<[1], [0], [0], [1], [0, 0, 1, 1], [], []>} : vector<128x128xbf16>, vector<128x256xbf16>, vector<128x256xf32> -> vector<128x256xf32>
    %c0_16 = arith.constant 0 : index
    %c0_17 = arith.constant 0 : index
    %29 = vector.load %arg5[%c0_16, %c0_17] : memref<4x128xbf16, #tpu.memory_space<vmem>>, vector<4x128xbf16>
    %30 = arith.truncf %28 : vector<128x256xf32> to vector<128x256xbf16>
    %cst_18 = arith.constant dense<0.000000e+00> : vector<4x256xf32>
    %31 = tpu.matmul %29, %30, %cst_18 {dimension_numbers = #tpu.dot_dimension_numbers<[1], [0], [0], [1], [0, 0, 1, 1], [], []>} : vector<4x128xbf16>, vector<128x256xbf16>, vector<4x256xf32> -> vector<4x256xf32>
    %c0_19 = arith.constant 0 : index
    %c0_20 = arith.constant 0 : index
    %32 = vector.load %arg6[%c0_19, %c0_20] : memref<4x1xf32, #tpu.memory_space<vmem>>, vector<4x1xf32>
    %33 = vector.broadcast %32 : vector<4x1xf32> to vector<4x256xf32>
    %34 = arith.addf %31, %33 : vector<4x256xf32>
    %c0_21 = arith.constant 0 : index
    %c0_22 = arith.constant 0 : index
    %c0_23 = arith.constant 0 : index
    %35 = vector.load %arg8[%c0_21, %c0_22, %c0_23] : memref<1x4x256xf32, #tpu.memory_space<vmem>>, vector<1x4x256xf32>
    %36 = vector.shape_cast %35 : vector<1x4x256xf32> to vector<4x256xf32>
    %37 = vector.shape_cast %34 : vector<4x256xf32> to vector<1x4x256xf32>
    tpu.vector_store %arg8[%c0_21, %c0_22, %c0_23], %37 {strides = array<i32>} : memref<1x4x256xf32, #tpu.memory_space<vmem>>, vector<1x4x256xf32>,
    return
  }
  func.func @transform_0(%arg0: i32) -> (i32, i32, i32) {
    %c0_i32 = arith.constant 0 : i32
    %c0_i32_0 = arith.constant 0 : i32
    %c0_i32_1 = arith.constant 0 : i32
    return %arg0, %c0_i32, %c0_i32_0 : i32, i32, i32
  }
  func.func @transform_1(%arg0: i32) -> (i32, i32) {
    %c0_i32 = arith.constant 0 : i32
    %c0_i32_0 = arith.constant 0 : i32
    %c0_i32_1 = arith.constant 0 : i32
    return %c0_i32, %c0_i32_0 : i32, i32
  }
  func.func @transform_2(%arg0: i32) -> (i32, i32) {
    %c0_i32 = arith.constant 0 : i32
    %c0_i32_0 = arith.constant 0 : i32
    %c0_i32_1 = arith.constant 0 : i32
    return %c0_i32, %c0_i32_0 : i32, i32
  }
  func.func @transform_3(%arg0: i32) -> (i32, i32) {
    %c0_i32 = arith.constant 0 : i32
    %c0_i32_0 = arith.constant 0 : i32
    %c0_i32_1 = arith.constant 0 : i32
    return %c0_i32, %c0_i32_0 : i32, i32
  }
  func.func @transform_4(%arg0: i32) -> (i32, i32) {
    %c0_i32 = arith.constant 0 : i32
    %c0_i32_0 = arith.constant 0 : i32
    %c0_i32_1 = arith.constant 0 : i32
    return %c0_i32, %c0_i32_0 : i32, i32
  }
  func.func @transform_5(%arg0: i32) -> (i32, i32) {
    %c0_i32 = arith.constant 0 : i32
    %c0_i32_0 = arith.constant 0 : i32
    %c0_i32_1 = arith.constant 0 : i32
    return %c0_i32, %c0_i32_0 : i32, i32
  }
  func.func @transform_6(%arg0: i32) -> (i32, i32) {
    %c0_i32 = arith.constant 0 : i32
    %c0_i32_0 = arith.constant 0 : i32
    %c0_i32_1 = arith.constant 0 : i32
    return %c0_i32, %c0_i32_0 : i32, i32
  }
  func.func @transform_7(%arg0: i32) -> (i32, i32, i32) {
    %c0_i32 = arith.constant 0 : i32
    %c0_i32_0 = arith.constant 0 : i32
    %c0_i32_1 = arith.constant 0 : i32
    return %arg0, %c0_i32, %c0_i32_0 : i32, i32, i32
  }
}

</mosaic_0001>

<bundles_post_ra>
// kernel: tpu_custom_call.1
= control target key start
LH: loop header
LB: loop body
LE: loop exit
PB: predicated region body
PF: predicated region fallthrough
CT: control target
= control target key end

     0   :  { %12 = vsyncpa [#allocation3], 0  ;;  %s2337_s0 = inlined_call_operand.vmem [shape: f32[2,4,256], index: 0, kind: input, shape index: {}]   ;;  %s2338_s1 = inlined_call_operand.vmem [shape: bf16[128,4], index: 1, kind: input, shape index: {}]   ;;  %s2339_s2 = inlined_call_operand.vmem [shape: bf16[128,4], index: 2, kind: input, shape index: {}]   ;;  %s2340_s3 = inlined_call_operand.vmem [shape: bf16[128,4], index: 3, kind: input, shape index: {}]   ;;  %s2341_s4 = inlined_call_operand.vmem [shape: bf16[4,128], index: 4, kind: input, shape index: {}]   ;;  %s2342_s5 = inlined_call_operand.vmem [shape: f32[4,1], index: 5, kind: input, shape index: {}]   ;;  %s2343_s6 = inlined_call_operand.vmem [shape: f32[128,128], index: 6, kind: input, shape index: {}]   ;;  %s2344_s7 = inlined_call_operand.hbm [shape: f32[2,4,256], index: 7, kind: output, shape index: {}]  }
   0x1   :  { %14 = vsyncpa [#allocation3 + $0x1], 0  ;;  %s1888_s24 = smov 0   ;;  %s1890_s25 = smov 0  }
   0x2   :  { %s1892_s26 = smov 0   ;;  %s1894_s27 = smov 0  }
   0x3 LB: > { %s1909_s28 = sadd.s32 4294967295, %s1844_s27   ;;  %s1584_s29 = sadd.s32 4294967294, %s1844_s27   ;;  %s1844_s27 = sphi %s1894_s27, %s2350_s27   ;;  %s1840_s26 = sphi %s1892_s26, %s2349_s26   ;;  %s1836_s25 = sphi %s1890_s25, %s2348_s25   ;;  %s1832_s24 = sphi %s1888_s24, %s2347_s24  }
   0x4   : > { %s1913_s30 = sadd.s32 1, %s1844_s27   ;;  %s179_s8 = sadd.s32 1, %s1840_s26 }
   0x5   : > { %s176_s9 = ssub.s32 %s1844_s27, %s1913_s30  ;;  %p189_p0 = scmp.ne.s32.totalorder %s1840_s26, %s1836_s25 }
   0x6   : > { %p177_p1 = scmp.eq.s32.totalorder %s176_s9, 0  ;;  %p190_p2 = scmp.eq.s32.totalorder %s1909_s28, 1 }
   0x7   : > { %p195_p3 = scmp.ne.s32.totalorder %s1836_s25, %s1832_s24  ;;  %p196_p4 = scmp.eq.s32.totalorder %s1584_s29, 1 }
   0x8   : > { %s1924_s10 = scalar_select %p177_p1, %s1840_s26, %s179_s8  }
   0x9   : > { %p1926_p5 = por %p190_p2, %p189_p0  ;;  %p1930_p6 = por %p196_p4, %p195_p3 }
   0xa   : > { %p1587_p7 = scmp.ge.s32.totalorder %s1844_s27, 1  ;;  %p240_p8 = scmp.lt.s32.totalorder %s1844_s27, 3 }
   0xc   : > { %p241_p9 = pnand %p1587_p7, %p240_p8 }
   0xd   : > { %p272_p10 = scmp.lt.s32.totalorder (!%p241_p9), %s1909_s28, 1  ;;  %v1846_v0 = vmov (!%p241_p9), 0   ;;  %vm365_vm0 = vcmask (!%p241_p9), 1041408   ;;  %v1694_v6 = vld [vmem:[%s2338_s1] sm:$0xff] (!%p241_p9)   ;;  %vm340_vm1 = vcmask (!%p241_p9), 31744   ;;  %v1707_v7 = vld [vmem:[%s2338_s1 + $0x28] sm:$0xff] (!%p241_p9)  }
   0xe   : > { %244 = sbr.rel (%p241_p9) target bundleno = 1312 (0x520), region = 48  ;;  %404 = vmatprep.mubr.bf16.mxu0 (!%p241_p9), %v1846_v0  ;;  %454 = vmatprep.mubr.bf16.mxu1 (!%p241_p9), %v1846_v0  ;;  %v1695_v8 = vld [vmem:[%s2338_s1 + $0x8] sm:$0xff] (!%p241_p9)   ;;  %v1708_v9 = vld [vmem:[%s2338_s1 + $0x30] sm:$0xff] (!%p241_p9)   ;;  %v1709_v11 = vld [vmem:[%s2338_s1 + $0x38] sm:$0xff] (!%p241_p9)   ;;  %s269_s18 = sand.u32 (!%p241_p9), 1, %s1836_s25  }
   0xf   : > { %1691 = vset.pattern.permute.xlu1 (!%p241_p9), %v1846_v0  ;;  %v1696_v10 = vld [vmem:[%s2338_s1 + $0x10] sm:$0xff] (!%p241_p9)   ;;  %v1697_v12 = vld [vmem:[%s2338_s1 + $0x18] sm:$0xff] (!%p241_p9)   ;;  %v1710_v13 = vld [vmem:[%s2340_s3] sm:$0xff] (!%p241_p9)   ;;  %s1588_s19 = sshll.u32 (!%p241_p9), %s269_s18, 3  ;;  %s1648_s20 = sshll.u32 (!%p241_p9), %s1909_s28, 7 }
  0x10   : > { %v1698_v14 = vld [vmem:[%s2338_s1 + $0x20] sm:$0xff] (!%p241_p9)   ;;  %v1711_v15 = vld [vmem:[%s2340_s3 + $0x8] sm:$0xff] (!%p241_p9)   ;;  %v1712_v17 = vld [vmem:[%s2340_s3 + $0x10] sm:$0xff] (!%p241_p9)   ;;  %s271_s21 = scalar_lea.vmem (!%p241_p9), [#allocation2], %s1588_s19  ;;  %s2295_s8 = scalar_lea.hbm (!%p241_p9), %s2344_s7, %s1648_s20 }
  0x11   : > { %v1699_v16 = vld [vmem:[%s2339_s2] sm:$0xff] (!%p241_p9)   ;;  %v1700_v18 = vld [vmem:[%s2339_s2 + $0x8] sm:$0xff] (!%p241_p9)   ;;  %v1713_v19 = vld [vmem:[%s2340_s3 + $0x18] sm:$0xff] (!%p241_p9)   ;;  %s1525_s22 = sshll.u32 (!%p241_p9), %s271_s21, 4  ;;  %s1511_s9 = scalar_lea.sflag (!%p241_p9), [#allocation3], %s269_s18  ;;  %s2297_s22 = int_to_ptr.vmem [resolvable:$true] %s1525_s22 }
  0x12   : > { %v1701_v20 = vld [vmem:[%s2339_s2 + $0x10] sm:$0xff] (!%p241_p9)   ;;  %v1714_v21 = vld [vmem:[%s2340_s3 + $0x20] sm:$0xff] (!%p241_p9)   ;;  %v1702_v22 = vld [vmem:[%s2339_s2 + $0x18] sm:$0xff] (!%p241_p9)  }
  0x13   : > { %v1715_v23 = vld [vmem:[%s2340_s3 + $0x28] sm:$0xff] (!%p241_p9)   ;;  %v1703_v24 = vld [vmem:[%s2339_s2 + $0x20] sm:$0xff] (!%p241_p9)   ;;  %v1716_v25 = vld [vmem:[%s2340_s3 + $0x30] sm:$0xff] (!%p241_p9)  }
  0x14   : > { %v1704_v26 = vld [vmem:[%s2339_s2 + $0x28] sm:$0xff] (!%p241_p9)   ;;  %v1717_v27 = vld [vmem:[%s2340_s3 + $0x38] sm:$0xff] (!%p241_p9)   ;;  %v1705_v28 = vld [vmem:[%s2339_s2 + $0x30] sm:$0xff] (!%p241_p9)  }
  0x15   : > { %s273_s13 = scalar_select %p272_p10, %s1909_s28, 1  ;;  %v1706_v29 = vld [vmem:[%s2339_s2 + $0x38] sm:$0xff]  }
  0x16   : > { %s1847_s28 = smov [#allocation2]  }
  0x17   : > { %s1647_s14 = sshll.u32 %s273_s13, 3  ;;  %s1782_s13 = scalar_lea.vmem %s2297_s22, 128 }
  0x18   : > { %s276_s17 = scalar_lea.vmem %s2337_s0, %s1647_s14  ;;  %p1783_p11 = scmp.ne.s32.totalorder %s2297_s22, %s1782_s13 }
  0x19   : > { %v278_v1 = vld [vmem:[%s276_s17] sm:$0xff]  ;;  %s1786_s14 = sshll.u32 %s1847_s28, 4  ;;  %s1787_s14 = int_to_ptr.vmem [resolvable:$false] %s1786_s14 }
  0x1a   : > { %v280_v2 = vcombine.high %v278_v1, %v278_v1  ;;  %v282_v3 = vpack.c.bf16 %v278_v1, %v278_v1  ;;  %p1784_p12 = pnand %p1783_p11, %p1926_p5  ;;  %s1788_s15 = scalar_lea.vmem %s1787_s14, 256 }
  0x1b   : > { %p1789_p0 = scmp.lt.s32.totalorder %s2297_s22, %s1787_s14  ;;  %p1790_p1 = scmp.lt.s32.totalorder %s1788_s15, %s1782_s13 }
  0x1c   : > { %v283_v4 = vpack.c.bf16 %v280_v2, %v280_v2  ;;  %v367_v5 = vsel %vm365_vm0, %v282_v3, 0  ;;  %p1785_p13 = pneg %p1784_p12 }
  0x1d   : > { %p1791_p2 = por %p1790_p1, %p1789_p0 }
  0x1e   : > { %1599 = vmatprep.subr.msk.bf16.mxu0 %vm365_vm0, %v283_v4  ;;  %1649 = vmatprep.subr.msk.bf16.mxu1 %vm365_vm0, %v283_v4 }
  0x1f   : > { %373 = vmatpush1.bf16.msra.mxu0 %v367_v5  ;;  %1650 = vmatpush1.bf16.msra.mxu1 %v367_v5  ;;  %p1792_p3 = pnand %p1791_p2, %p1785_p13 }
  0x20   : > { %1633 = vmatprep.subr.msk.bf16.mxu0 %vm365_vm0, %v283_v4  ;;  %1616 = vmatprep.subr.msk.bf16.mxu1 %vm365_vm0, %v283_v4 }
  0x22   : > { %1600 = vmatmul.mubr.msk.bf16.vlgmr.msra.gmra.mrb[0].mxu0 %vm340_vm1, %v1694_v6  ;;  %1605 = vmatmul.mubr.msk.bf16.vlgmr.msra.gmra.mrb[0].mxu1 %vm340_vm1, %v1707_v7 }
  0x23   : > { %791 = vmatpush1.bf16.msra.mxu0 %v367_v5  ;;  %414 = vmatprep.mubr.bf16.mxu0 %v1846_v0 }
  0x24   : > { %464 = vmatprep.mubr.bf16.mxu1 %v1846_v0  ;;  %582 = vmatpush1.bf16.msra.mxu1 %v367_v5 }
  0x2a   : > { %1601 = vmatmul.mubr.msk.bf16.gmra.mrb[4].mxu0 %vm340_vm1, %v1695_v8  ;;  %1606 = vmatmul.mubr.msk.bf16.gmra.mrb[4].mxu1 %vm340_vm1, %v1708_v9 }
  0x2b   : > { %424 = vmatprep.mubr.bf16.mxu0 %v1846_v0  ;;  %474 = vmatprep.mubr.bf16.mxu1 %v1846_v0 }
  0x32   : > { %1602 = vmatmul.mubr.msk.bf16.gmra.mrb[8].mxu0 %vm340_vm1, %v1696_v10  ;;  %1607 = vmatmul.mubr.msk.bf16.gmra.mrb[8].mxu1 %vm340_vm1, %v1709_v11 }
  0x33   : > { %434 = vmatprep.mubr.bf16.mxu0 %v1846_v0  ;;  %613 = vmatprep.mubr.bf16.mxu1 %v1846_v0 }
  0x3a   : > { %1603 = vmatmul.mubr.msk.bf16.gmra.mrb[12].mxu0 %vm340_vm1, %v1697_v12  ;;  %1617 = vmatmul.mubr.msk.bf16.vlgmr.msra.gmra.mrb[12].mxu1 %vm340_vm1, %v1710_v13 }
  0x3b   : > { %444 = vmatprep.mubr.bf16.mxu0 %v1846_v0  ;;  %623 = vmatprep.mubr.bf16.mxu1 %v1846_v0 }
  0x42   : > { %1604 = vmatmul.mubr.msk.bf16.gmra.mrb[16].mxu0 %vm340_vm1, %v1698_v14  ;;  %1618 = vmatmul.mubr.msk.bf16.gmra.mrb[16].mxu1 %vm340_vm1, %v1711_v15 }
  0x43   : > { %822 = vmatprep.mubr.bf16.mxu0 %v1846_v0  ;;  %633 = vmatprep.mubr.bf16.mxu1 %v1846_v0 }
  0x4a   : > { %1634 = vmatmul.mubr.msk.bf16.vlgmr.msra.gmra.mrb[20].mxu0 %vm340_vm1, %v1699_v16  ;;  %1619 = vmatmul.mubr.msk.bf16.gmra.mrb[20].mxu1 %vm340_vm1, %v1712_v17 }
  0x4b   : > { %832 = vmatprep.mubr.bf16.mxu0 %v1846_v0  ;;  %643 = vmatprep.mubr.bf16.mxu1 %v1846_v0 }
  0x52   : > { %1635 = vmatmul.mubr.msk.bf16.gmra.mrb[24].mxu0 %vm340_vm1, %v1700_v18  ;;  %1620 = vmatmul.mubr.msk.bf16.gmra.mrb[24].mxu1 %vm340_vm1, %v1713_v19 }
  0x53   : > { %842 = vmatprep.mubr.bf16.mxu0 %v1846_v0  ;;  %653 = vmatprep.mubr.bf16.mxu1 %v1846_v0 }
  0x5a   : > { %1636 = vmatmul.mubr.msk.bf16.gmra.mrb[28].mxu0 %vm340_vm1, %v1701_v20  ;;  %1621 = vmatmul.mubr.msk.bf16.gmra.mrb[28].mxu1 %vm340_vm1, %v1714_v21 }
  0x5b   : > { %852 = vmatprep.mubr.bf16.mxu0 %v1846_v0  ;;  %663 = vmatprep.mubr.bf16.mxu1 %v1846_v0 }
  0x62   : > { %1637 = vmatmul.mubr.msk.bf16.gmra.mrb[32].mxu0 %vm340_vm1, %v1702_v22  ;;  %1622 = vmatmul.mubr.msk.bf16.gmra.mrb[32].mxu1 %vm340_vm1, %v1715_v23 }
  0x63   : > { %862 = vmatprep.mubr.bf16.mxu0 %v1846_v0  ;;  %673 = vmatprep.mubr.bf16.mxu1 %v1846_v0 }
  0x6a   : > { %1638 = vmatmul.mubr.msk.bf16.gmra.mrb[36].mxu0 %vm340_vm1, %v1703_v24  ;;  %1623 = vmatmul.mubr.msk.bf16.gmra.mrb[36].mxu1 %vm340_vm1, %v1716_v25 }
  0x6b   : > { %872 = vmatprep.mubr.bf16.mxu0 %v1846_v0  ;;  %683 = vmatprep.mubr.bf16.mxu1 %v1846_v0 }
  0x72   : > { %1639 = vmatmul.mubr.msk.bf16.gmra.mrb[40].mxu0 %vm340_vm1, %v1704_v26  ;;  %1624 = vmatmul.mubr.msk.bf16.gmra.mrb[40].mxu1 %vm340_vm1, %v1717_v27 }
  0x73   : > { %882 = vmatprep.mubr.bf16.mxu0 %v1846_v0 }
  0x7a   : > { %1640 = vmatmul.mubr.msk.bf16.gmra.mrb[44].mxu0 %vm340_vm1, %v1705_v28 }
  0x7b   : > { %892 = vmatprep.mubr.bf16.mxu0 %v1846_v0 }
  0x82   : > { %1641 = vmatmul.mubr.msk.bf16.gmra.mrb[48].mxu0 %vm340_vm1, %v1706_v29 }
  0x83   : > { %1360 = vmatprep.mubr.bf16.mxu0 %v1846_v0 }
  0xf5   : > { %v406_v30 = vpop.f32.mrb[0].mxu0  ;;  %v2063_v33 = vpop.f32.mrb[0].mxu1 }
  0xf6   : > { %v408_v31 = vpop.f32.mrb[1].mxu0  ;;  %v2065_v36 = vpop.f32.mrb[1].mxu1 }
  0xf7   : > { %v410_v32 = vpop.f32.mrb[2].mxu0  ;;  %v2067_v38 = vpop.f32.mrb[2].mxu1 }
  0xf8   : > { %v485_v34 = vpack.c.bf16 %v410_v32, %v406_v30  ;;  %v412_v35 = vpop.f32.mrb[3].mxu0  ;;  %v495_v39 = vpack.c.bf16 %v2067_v38, %v2063_v33  ;;  %v2071_v40 = vpop.f32.mrb[3].mxu1 }
  0xf9   : > { %v486_v37 = vpack.c.bf16 %v412_v35, %v408_v31  ;;  %v496_v41 = vpack.c.bf16 %v2071_v40, %v2065_v36 }
  0xfb   : > { %1328 = vmatprep.subr.bf16.mxu0 %v486_v37 }
  0xfc   : > { %1329 = vmatpush1.bf16.msra.mxu0 %v485_v34 }
  0xfd   : > { %v416_v42 = vpop.f32.mrb[4].mxu0  ;;  %v2075_v45 = vpop.f32.mrb[4].mxu1 }
  0xfe   : > { %v418_v43 = vpop.f32.mrb[5].mxu0  ;;  %v2077_v48 = vpop.f32.mrb[5].mxu1 }
  0xff   : > { %v420_v44 = vpop.f32.mrb[6].mxu0  ;;  %v2079_v50 = vpop.f32.mrb[6].mxu1 }
 0x100   : > { %v487_v46 = vpack.c.bf16 %v420_v44, %v416_v42  ;;  %v422_v47 = vpop.f32.mrb[7].mxu0  ;;  %v497_v51 = vpack.c.bf16 %v2079_v50, %v2075_v45  ;;  %v472_v52 = vpop.f32.mrb[7].mxu1 }
 0x101   : > { %v488_v49 = vpack.c.bf16 %v422_v47, %v418_v43  ;;  %v498_v53 = vpack.c.bf16 %v472_v52, %v2077_v48 }
 0x103   : > { %1330 = vmatprep.subr.bf16.mxu0 %v488_v49 }
 0x104   : > { %1331 = vmatpush1.bf16.msra.mxu0 %v487_v46 }
 0x105   : > { %v426_v54 = vpop.f32.mrb[8].mxu0  ;;  %v2084_v57 = vpop.f32.mrb[8].mxu1 }
 0x106   : > { %v428_v55 = vpop.f32.mrb[9].mxu0  ;;  %v478_v60 = vpop.f32.mrb[9].mxu1 }
 0x107   : > { %v430_v56 = vpop.f32.mrb[10].mxu0  ;;  %v2086_v62 = vpop.f32.mrb[10].mxu1 }
 0x108   : > { %v489_v58 = vpack.c.bf16 %v430_v56, %v426_v54  ;;  %v432_v59 = vpop.f32.mrb[11].mxu0  ;;  %v499_v63 = vpack.c.bf16 %v2086_v62, %v2084_v57  ;;  %v482_v1 = vpop.f32.mrb[11].mxu1 }
 0x109   : > { %v490_v61 = vpack.c.bf16 %v432_v59, %v428_v55  ;;  %v500_v2 = vpack.c.bf16 %v482_v1, %v478_v60 }
 0x10b   : > { %1332 = vmatprep.subr.bf16.mxu0 %v490_v61 }
 0x10c   : > { %1333 = vmatpush1.bf16.msra.mxu0 %v489_v58 }
 0x10d   : > { %v436_v3 = vpop.f32.mrb[12].mxu0  ;;  %v615_v6 = vpop.f32.mrb[12].mxu1 }
 0x10e   : > { %v438_v4 = vpop.f32.mrb[13].mxu0  ;;  %v617_v9 = vpop.f32.mrb[13].mxu1 }
 0x10f   : > { %v440_v5 = vpop.f32.mrb[14].mxu0  ;;  %v619_v11 = vpop.f32.mrb[14].mxu1 }
 0x110   : > { %v491_v7 = vpack.c.bf16 %v440_v5, %v436_v3  ;;  %v442_v8 = vpop.f32.mrb[15].mxu0  ;;  %v694_v12 = vpack.c.bf16 %v619_v11, %v615_v6  ;;  %v621_v13 = vpop.f32.mrb[15].mxu1 }
 0x111   : > { %v492_v10 = vpack.c.bf16 %v442_v8, %v438_v4  ;;  %v695_v14 = vpack.c.bf16 %v621_v13, %v617_v9 }
 0x113   : > { %1334 = vmatprep.subr.bf16.mxu0 %v492_v10  ;;  %1127 = vmatprep.subr.bf16.mxu1 %v695_v14 }
 0x114   : > { %1335 = vmatpush1.bf16.msra.mxu0 %v491_v7  ;;  %1128 = vmatpush1.bf16.xpose.msra.mxu1 %v694_v12 }
 0x115   : > { %v446_v15 = vpop.f32.mrb[16].mxu0  ;;  %v625_v18 = vpop.f32.mrb[16].mxu1 }
 0x116   : > { %v448_v16 = vpop.f32.mrb[17].mxu0  ;;  %v627_v21 = vpop.f32.mrb[17].mxu1 }
 0x117   : > { %v450_v17 = vpop.f32.mrb[18].mxu0  ;;  %v629_v23 = vpop.f32.mrb[18].mxu1 }
 0x118   : > { %v493_v19 = vpack.c.bf16 %v450_v17, %v446_v15  ;;  %v452_v20 = vpop.f32.mrb[19].mxu0  ;;  %v696_v24 = vpack.c.bf16 %v629_v23, %v625_v18  ;;  %v631_v25 = vpop.f32.mrb[19].mxu1 }
 0x119   : > { %v494_v22 = vpack.c.bf16 %v452_v20, %v448_v16  ;;  %v697_v26 = vpack.c.bf16 %v631_v25, %v627_v21 }
 0x11b   : > { %1336 = vmatprep.subr.bf16.mxu0 %v494_v22  ;;  %1129 = vmatprep.subr.bf16.mxu1 %v697_v26 }
 0x11c   : > { %1337 = vmatpush1.bf16.msra.mxu0 %v493_v19  ;;  %1130 = vmatpush1.bf16.xpose.msra.mxu1 %v696_v24 }
 0x11d   : > { %v2090_v27 = vpop.f32.mrb[20].mxu0  ;;  %1338 = vmatprep.subr.bf16.mxu0 %v496_v41  ;;  %v635_v31 = vpop.f32.mrb[20].mxu1 }
 0x11e   : > { %v2092_v28 = vpop.f32.mrb[21].mxu0  ;;  %v637_v34 = vpop.f32.mrb[21].mxu1 }
 0x11f   : > { %v2094_v29 = vpop.f32.mrb[22].mxu0  ;;  %v903_v30 = vmax.f32 %v2090_v27, %v2092_v28  ;;  %v639_v36 = vpop.f32.mrb[22].mxu1 }
 0x120   : > { %v2098_v32 = vpop.f32.mrb[23].mxu0  ;;  %1339 = vmatpush1.bf16.msra.mxu0 %v495_v39  ;;  %v698_v37 = vpack.c.bf16 %v639_v36, %v635_v31  ;;  %v641_v40 = vpop.f32.mrb[23].mxu1 }
 0x121   : > { %904 = vmax.xlane.f32.xlu0 %v903_v30  ;;  %v906_v35 = vmax.f32 %v2094_v29, %v2098_v32  ;;  %1340 = vmatprep.subr.bf16.mxu0 %v498_v53  ;;  %v699_v41 = vpack.c.bf16 %v641_v40, %v637_v34 }
 0x123   : > { %1131 = vmatprep.subr.bf16.mxu1 %v699_v41 }
 0x124   : > { %1341 = vmatpush1.bf16.msra.mxu0 %v497_v51  ;;  %1132 = vmatpush1.bf16.xpose.msra.mxu1 %v698_v37 }
 0x125   : > { %907 = vmax.xlane.f32.xlu0 %v906_v35  ;;  %v2108_v42 = vpop.f32.mrb[24].mxu0  ;;  %1342 = vmatprep.subr.bf16.mxu0 %v500_v2  ;;  %v645_v43 = vpop.f32.mrb[24].mxu1 }
 0x126   : > { %v2110_v33 = vpop.f32.mrb[25].mxu0  ;;  %v647_v45 = vpop.f32.mrb[25].mxu1 }
 0x127   : > { %v2112_v38 = vpop.f32.mrb[26].mxu0  ;;  %v909_v39 = vmax.f32 %v2108_v42, %v2110_v33  ;;  %v649_v47 = vpop.f32.mrb[26].mxu1 }
 0x128   : > { %v2116_v44 = vpop.f32.mrb[27].mxu0  ;;  %1343 = vmatpush1.bf16.msra.mxu0 %v499_v63  ;;  %v700_v48 = vpack.c.bf16 %v649_v47, %v645_v43  ;;  %v651_v49 = vpop.f32.mrb[27].mxu1 }
 0x129   : > { %910 = vmax.xlane.f32.xlu1 %v909_v39  ;;  %v912_v46 = vmax.f32 %v2112_v38, %v2116_v44  ;;  %v701_v50 = vpack.c.bf16 %v651_v49, %v647_v45 }
 0x12b   : > { %1133 = vmatprep.subr.bf16.mxu1 %v701_v50 }
 0x12c   : > { %1134 = vmatpush1.bf16.xpose.msra.mxu1 %v700_v48 }
 0x12d   : > { %913 = vmax.xlane.f32.xlu1 %v912_v46  ;;  %v2123_v51 = vpop.f32.mrb[28].mxu0  ;;  %v655_v55 = vpop.f32.mrb[28].mxu1 }
 0x12e   : > { %v2125_v52 = vpop.f32.mrb[29].mxu0  ;;  %v657_v57 = vpop.f32.mrb[29].mxu1 }
 0x12f   : > { %v2127_v53 = vpop.f32.mrb[30].mxu0  ;;  %v915_v54 = vmax.f32 %v2123_v51, %v2125_v52  ;;  %v659_v59 = vpop.f32.mrb[30].mxu1 }
 0x130   : > { %v2131_v56 = vpop.f32.mrb[31].mxu0  ;;  %v702_v60 = vpack.c.bf16 %v659_v59, %v655_v55  ;;  %v661_v61 = vpop.f32.mrb[31].mxu1 }
 0x131   : > { %916 = vmax.xlane.f32.xlu0 %v915_v54  ;;  %v918_v58 = vmax.f32 %v2127_v53, %v2131_v56  ;;  %v703_v62 = vpack.c.bf16 %v661_v61, %v657_v57 }
 0x133   : > { %919 = vmax.xlane.f32.xlu1 %v918_v58  ;;  %1135 = vmatprep.subr.bf16.mxu1 %v703_v62 }
 0x134   : > { %1136 = vmatpush1.bf16.xpose.msra.mxu1 %v702_v60 }
 0x135   : > { %v2135_v63 = vpop.f32.mrb[32].mxu0  ;;  %v665_v4 = vpop.f32.mrb[32].mxu1 }
 0x136   : > { %v2137_v1 = vpop.f32.mrb[33].mxu0  ;;  %v667_v6 = vpop.f32.mrb[33].mxu1 }
 0x137   : > { %v2139_v2 = vpop.f32.mrb[34].mxu0  ;;  %v921_v3 = vmax.f32 %v2135_v63, %v2137_v1  ;;  %v669_v8 = vpop.f32.mrb[34].mxu1 }
 0x138   : > { %v2143_v5 = vpop.f32.mrb[35].mxu0  ;;  %v704_v9 = vpack.c.bf16 %v669_v8, %v665_v4  ;;  %v671_v10 = vpop.f32.mrb[35].mxu1 }
 0x139   : > { %922 = vmax.xlane.f32.xlu0 %v921_v3  ;;  %v924_v7 = vmax.f32 %v2139_v2, %v2143_v5  ;;  %v705_v11 = vpack.c.bf16 %v671_v10, %v667_v6 }
 0x13b   : > { %925 = vmax.xlane.f32.xlu1 %v924_v7  ;;  %1137 = vmatprep.subr.bf16.mxu1 %v705_v11 }
 0x13c   : > { %1138 = vmatpush1.bf16.xpose.msra.mxu1 %v704_v9 }
 0x13d   : > { %v2147_v12 = vpop.f32.mrb[36].mxu0  ;;  %v675_v16 = vpop.f32.mrb[36].mxu1 }
 0x13e   : > { %v2149_v13 = vpop.f32.mrb[37].mxu0  ;;  %v677_v18 = vpop.f32.mrb[37].mxu1 }
 0x13f   : > { %v2151_v14 = vpop.f32.mrb[38].mxu0  ;;  %v927_v15 = vmax.f32 %v2147_v12, %v2149_v13  ;;  %v679_v20 = vpop.f32.mrb[38].mxu1 }
 0x140   : > { %v2155_v17 = vpop.f32.mrb[39].mxu0  ;;  %v706_v21 = vpack.c.bf16 %v679_v20, %v675_v16  ;;  %v681_v22 = vpop.f32.mrb[39].mxu1 }
 0x141   : > { %928 = vmax.xlane.f32.xlu0 %v927_v15  ;;  %v930_v19 = vmax.f32 %v2151_v14, %v2155_v17  ;;  %v707_v23 = vpack.c.bf16 %v681_v22, %v677_v18 }
 0x143   : > { %931 = vmax.xlane.f32.xlu1 %v930_v19  ;;  %1139 = vmatprep.subr.bf16.mxu1 %v707_v23 }
 0x144   : > { %1140 = vmatpush1.bf16.xpose.msra.mxu1 %v706_v21 }
 0x145   : > { %v2159_v24 = vpop.f32.mrb[40].mxu0  ;;  %v685_v31 = vpop.f32.mrb[40].mxu1 }
 0x146   : > { %v2161_v25 = vpop.f32.mrb[41].mxu0  ;;  %v687_v35 = vpop.f32.mrb[41].mxu1 }
 0x147   : > { %v2163_v26 = vpop.f32.mrb[42].mxu0  ;;  %v933_v30 = vmax.f32 %v2159_v24, %v2161_v25  ;;  %v689_v37 = vpop.f32.mrb[42].mxu1 }
 0x148   : > { %v2167_v34 = vpop.f32.mrb[43].mxu0  ;;  %v708_v40 = vpack.c.bf16 %v689_v37, %v685_v31  ;;  %v691_v41 = vpop.f32.mrb[43].mxu1 }
 0x149   : > { %934 = vmax.xlane.f32.xlu0 %v933_v30  ;;  %v936_v36 = vmax.f32 %v2163_v26, %v2167_v34  ;;  %v709_v39 = vpack.c.bf16 %v691_v41, %v687_v35 }
 0x14b   : > { %937 = vmax.xlane.f32.xlu1 %v936_v36  ;;  %1141 = vmatprep.subr.bf16.mxu1 %v709_v39 }
 0x14c   : > { %1142 = vmatpush1.bf16.xpose.msra.mxu1 %v708_v40 }
 0x14d   : > { %v2171_v43 = vpop.f32.mrb[44].mxu0 }
 0x14e   : > { %v2173_v45 = vpop.f32.mrb[45].mxu0 }
 0x14f   : > { %v2175_v46 = vpop.f32.mrb[46].mxu0  ;;  %v939_v47 = vmax.f32 %v2171_v43, %v2173_v45 }
 0x150   : > { %v2179_v48 = vpop.f32.mrb[47].mxu0 }
 0x151   : > { %940 = vmax.xlane.f32.xlu0 %v939_v47  ;;  %v942_v49 = vmax.f32 %v2175_v46, %v2179_v48 }
 0x153   : > { %943 = vmax.xlane.f32.xlu1 %v942_v49 }
 0x155   : > { %v2183_v50 = vpop.f32.mrb[48].mxu0 }
 0x156   : > { %v2185_v54 = vpop.f32.mrb[49].mxu0 }
 0x157   : > { %v2187_v55 = vpop.f32.mrb[50].mxu0  ;;  %v945_v57 = vmax.f32 %v2183_v50, %v2185_v54 }
 0x158   : > { %v2191_v58 = vpop.f32.mrb[51].mxu0 }
 0x159   : > { %946 = vmax.xlane.f32.xlu0 %v945_v57  ;;  %v948_v59 = vmax.f32 %v2187_v55, %v2191_v58 }
 0x15b   : > { %949 = vmax.xlane.f32.xlu1 %v948_v59 }
 0x1ae   : > { %v905_v60 = vpop.xlane.xlu0 %904 }
 0x1af   : > { %v951_v62 = vsub.f32 %v2090_v27, %v905_v60  ;;  %v952_v3 = vsub.f32 %v2092_v28, %v905_v60 }
 0x1b2   : > { %v908_v61 = vpop.xlane.xlu0 %907 }
 0x1b3   : > { %v953_v4 = vsub.f32 %v2094_v29, %v908_v61  ;;  %v954_v6 = vsub.f32 %v2098_v32, %v908_v61 }
 0x1b5   : > { %v983_v7 = vpack.c.bf16 %v953_v4, %v951_v62  ;;  %v984_v8 = vpack.c.bf16 %v954_v6, %v952_v3 }
 0x1b6   : > { %v911_v9 = vpop.xlane.xlu1 %910 }
 0x1b7   : > { %v1000_v10 = vmul.bf16 1069105081, %v983_v7  ;;  %v1003_v11 = vmul.bf16 1069105081, %v984_v8  ;;  %v955_v16 = vsub.f32 %v2108_v42, %v911_v9  ;;  %v956_v18 = vsub.f32 %v2110_v33, %v911_v9 }
 0x1b9   : > { %1718 = vpow.bf16 %v1000_v10 }
 0x1ba   : > { %1720 = vpow.bf16 %v1003_v11  ;;  %v914_v15 = vpop.xlane.xlu1 %913 }
 0x1bb   : > { %v957_v27 = vsub.f32 %v2112_v38, %v914_v15  ;;  %v958_v28 = vsub.f32 %v2116_v44, %v914_v15 }
 0x1bd   : > { %v985_v19 = vpack.c.bf16 %v957_v27, %v955_v16  ;;  %v986_v29 = vpack.c.bf16 %v958_v28, %v956_v18 }
 0x1be   : > { %v917_v20 = vpop.xlane.xlu0 %916 }
 0x1bf   : > { %v1006_v32 = vmul.bf16 1069105081, %v985_v19  ;;  %v1009_v21 = vmul.bf16 1069105081, %v986_v29  ;;  %v959_v22 = vsub.f32 %v2123_v51, %v917_v20  ;;  %v960_v30 = vsub.f32 %v2125_v52, %v917_v20 }
 0x1c0   : > { %v920_v23 = vpop.xlane.xlu1 %919 }
 0x1c1   : > { %1722 = vpow.bf16 %v1006_v32  ;;  %v961_v31 = vsub.f32 %v2127_v53, %v920_v23  ;;  %v962_v42 = vsub.f32 %v2131_v56, %v920_v23 }
 0x1c2   : > { %1724 = vpow.bf16 %v1009_v21 }
 0x1c3   : > { %v987_v33 = vpack.c.bf16 %v961_v31, %v959_v22  ;;  %v988_v38 = vpack.c.bf16 %v962_v42, %v960_v30 }
 0x1c4   : > { %v1719_v35 = vpop.eup %1718 }
 0x1c5   : > { %v1721_v44 = vpop.eup %1720  ;;  %v1012_v36 = vmul.bf16 1069105081, %v987_v33  ;;  %v1015_v37 = vmul.bf16 1069105081, %v988_v38  ;;  %v1047_v40 = vunpack.c.l.bf16 %v1719_v35  ;;  %v1049_v41 = vunpack.c.h.bf16 %v1719_v35 }
 0x1c6   : > { %1159 = vmatprep.mubr.bf16.mxu1 %v1721_v44  ;;  %v923_v39 = vpop.xlane.xlu0 %922  ;;  %v1048_v51 = vunpack.c.l.bf16 %v1721_v44  ;;  %v1050_v47 = vunpack.c.h.bf16 %v1721_v44 }
 0x1c7   : > { %1726 = vpow.bf16 %v1012_v36  ;;  %1160 = vmatmul.mubr.bf16.vlgmr.msra.gmra.mrb[44].mxu1 %v1719_v35  ;;  %v963_v56 = vsub.f32 %v2135_v63, %v923_v39  ;;  %v964_v57 = vsub.f32 %v2137_v1, %v923_v39 }
 0x1c8   : > { %1728 = vpow.bf16 %v1015_v37  ;;  %v926_v52 = vpop.xlane.xlu1 %925  ;;  %v1079_v53 = vadd.f32 %v1048_v51, %v1047_v40  ;;  %v1082_v49 = vadd.f32 %v1050_v47, %v1049_v41 }
 0x1c9   : > { %v965_v59 = vsub.f32 %v2139_v2, %v926_v52  ;;  %v966_v60 = vsub.f32 %v2143_v5, %v926_v52 }
 0x1ca   : > { %1080 = vadd.xlane.f32.xlu0 %v1079_v53  ;;  %1083 = vadd.xlane.f32.xlu1 %v1082_v49 }
 0x1cb   : > { %v989_v61 = vpack.c.bf16 %v965_v59, %v963_v56  ;;  %v990_v62 = vpack.c.bf16 %v966_v60, %v964_v57 }
 0x1cc   : > { %v1723_v3 = vpop.eup %1722 }
 0x1cd   : > { %v1725_v4 = vpop.eup %1724  ;;  %v1018_v6 = vmul.bf16 1069105081, %v989_v61  ;;  %v1021_v7 = vmul.bf16 1069105081, %v990_v62  ;;  %v1051_v8 = vunpack.c.l.bf16 %v1723_v3  ;;  %v1053_v9 = vunpack.c.h.bf16 %v1723_v3 }
 0x1ce   : > { %1167 = vmatprep.mubr.bf16.mxu1 %v1725_v4  ;;  %v929_v10 = vpop.xlane.xlu0 %928  ;;  %v1052_v11 = vunpack.c.l.bf16 %v1725_v4  ;;  %v1054_v63 = vunpack.c.h.bf16 %v1725_v4 }
 0x1cf   : > { %1730 = vpow.bf16 %v1018_v6  ;;  %1168 = vmatmul.mubr.bf16.gmra.mrb[48].mxu1 %v1723_v3  ;;  %v967_v15 = vsub.f32 %v2147_v12, %v929_v10  ;;  %v968_v16 = vsub.f32 %v2149_v13, %v929_v10 }
 0x1d0   : > { %1732 = vpow.bf16 %v1021_v7  ;;  %v932_v1 = vpop.xlane.xlu1 %931  ;;  %v1085_v2 = vadd.f32 %v1052_v11, %v1051_v8  ;;  %v1088_v5 = vadd.f32 %v1054_v63, %v1053_v9 }
 0x1d1   : > { %v969_v18 = vsub.f32 %v2151_v14, %v932_v1  ;;  %v970_v27 = vsub.f32 %v2155_v17, %v932_v1 }
 0x1d2   : > { %v1727_v28 = vpop.eup %1726  ;;  %1086 = vadd.xlane.f32.xlu0 %v1085_v2  ;;  %1089 = vadd.xlane.f32.xlu1 %v1088_v5 }
 0x1d3   : > { %v1729_v19 = vpop.eup %1728  ;;  %v991_v29 = vpack.c.bf16 %v969_v18, %v967_v15  ;;  %v992_v20 = vpack.c.bf16 %v970_v27, %v968_v16  ;;  %v1055_v32 = vunpack.c.l.bf16 %v1727_v28  ;;  %v1057_v21 = vunpack.c.h.bf16 %v1727_v28 }
 0x1d4   : > { %1175 = vmatprep.mubr.bf16.mxu1 %v1729_v19  ;;  %v1056_v22 = vunpack.c.l.bf16 %v1729_v19  ;;  %v1058_v23 = vunpack.c.h.bf16 %v1729_v19 }
 0x1d5   : > { %v1024_v30 = vmul.bf16 1069105081, %v991_v29  ;;  %v1027_v31 = vmul.bf16 1069105081, %v992_v20 }
 0x1d6   : > { %v935_v12 = vpop.xlane.xlu0 %934  ;;  %v1091_v42 = vadd.f32 %v1056_v22, %v1055_v32  ;;  %v1094_v13 = vadd.f32 %v1058_v23, %v1057_v21 }
 0x1d7   : > { %1734 = vpow.bf16 %v1024_v30  ;;  %1176 = vmatmul.mubr.bf16.gmra.mrb[52].mxu1 %v1727_v28  ;;  %v971_v17 = vsub.f32 %v2159_v24, %v935_v12  ;;  %v972_v33 = vsub.f32 %v2161_v25, %v935_v12 }
 0x1d8   : > { %1736 = vpow.bf16 %v1027_v31  ;;  %1092 = vadd.xlane.f32.xlu0 %v1091_v42  ;;  %1095 = vadd.xlane.f32.xlu1 %v1094_v13  ;;  %v938_v14 = vpop.xlane.xlu1 %937 }
 0x1d9   : > { %v973_v38 = vsub.f32 %v2163_v26, %v938_v14  ;;  %v974_v35 = vsub.f32 %v2167_v34, %v938_v14 }
 0x1da   : > { %v1731_v44 = vpop.eup %1730 }
 0x1db   : > { %v1733_v36 = vpop.eup %1732  ;;  %v993_v37 = vpack.c.bf16 %v973_v38, %v971_v17  ;;  %v994_v40 = vpack.c.bf16 %v974_v35, %v972_v33  ;;  %v1059_v41 = vunpack.c.l.bf16 %v1731_v44  ;;  %v1061_v39 = vunpack.c.h.bf16 %v1731_v44 }
 0x1dc   : > { %1183 = vmatprep.mubr.bf16.mxu1 %v1733_v36  ;;  %v1060_v51 = vunpack.c.l.bf16 %v1733_v36  ;;  %v1062_v47 = vunpack.c.h.bf16 %v1733_v36 }
 0x1dd   : > { %v1030_v52 = vmul.bf16 1069105081, %v993_v37  ;;  %v1033_v53 = vmul.bf16 1069105081, %v994_v40 }
 0x1de   : > { %v941_v49 = vpop.xlane.xlu0 %940  ;;  %v1097_v56 = vadd.f32 %v1060_v51, %v1059_v41  ;;  %v1100_v24 = vadd.f32 %v1062_v47, %v1061_v39  ;;  %v1224_v51 = vld [vmem:[%s2343_s6] sm:$0xff] }
 0x1df   : > { %1738 = vpow.bf16 %v1030_v52  ;;  %1184 = vmatmul.mubr.bf16.gmra.mrb[56].mxu1 %v1731_v44  ;;  %v975_v26 = vsub.f32 %v2171_v43, %v941_v49  ;;  %v976_v34 = vsub.f32 %v2173_v45, %v941_v49 }
 0x1e0   : > { %1740 = vpow.bf16 %v1033_v53  ;;  %1098 = vadd.xlane.f32.xlu0 %v1097_v56  ;;  %1101 = vadd.xlane.f32.xlu1 %v1100_v24  ;;  %v944_v25 = vpop.xlane.xlu1 %943  ;;  %v1225_v56 = vld [vmem:[%s2343_s6 + $0x8] sm:$0xff] }
 0x1e1   : > { %v977_v57 = vsub.f32 %v2175_v46, %v944_v25  ;;  %v978_v59 = vsub.f32 %v2179_v48, %v944_v25 }
 0x1e2   : > { %v1735_v60 = vpop.eup %1734 }
 0x1e3   : > { %v1737_v61 = vpop.eup %1736  ;;  %v995_v62 = vpack.c.bf16 %v977_v57, %v975_v26  ;;  %v996_v3 = vpack.c.bf16 %v978_v59, %v976_v34  ;;  %v1063_v4 = vunpack.c.l.bf16 %v1735_v60  ;;  %v1065_v6 = vunpack.c.h.bf16 %v1735_v60 }
 0x1e4   : > { %1191 = vmatprep.mubr.bf16.mxu1 %v1737_v61  ;;  %v1064_v7 = vunpack.c.l.bf16 %v1737_v61  ;;  %v1066_v8 = vunpack.c.h.bf16 %v1737_v61  ;;  %v1226_v61 = vld [vmem:[%s2343_s6 + $0x10] sm:$0xff] }
 0x1e5   : > { %v1036_v9 = vmul.bf16 1069105081, %v995_v62  ;;  %v1039_v10 = vmul.bf16 1069105081, %v996_v3 }
 0x1e6   : > { %v947_v11 = vpop.xlane.xlu0 %946  ;;  %v1103_v63 = vadd.f32 %v1064_v7, %v1063_v4  ;;  %v1106_v43 = vadd.f32 %v1066_v8, %v1065_v6  ;;  %v1227_v8 = vld [vmem:[%s2343_s6 + $0x18] sm:$0xff] }
 0x1e7   : > { %1742 = vpow.bf16 %v1036_v9  ;;  %1192 = vmatmul.mubr.bf16.gmra.mrb[60].mxu1 %v1735_v60  ;;  %v979_v46 = vsub.f32 %v2183_v50, %v947_v11  ;;  %v980_v48 = vsub.f32 %v2185_v54, %v947_v11 }
 0x1e8   : > { %1744 = vpow.bf16 %v1039_v10  ;;  %1104 = vadd.xlane.f32.xlu0 %v1103_v63  ;;  %1107 = vadd.xlane.f32.xlu1 %v1106_v43  ;;  %v950_v45 = vpop.xlane.xlu1 %949 }
 0x1e9   : > { %v981_v1 = vsub.f32 %v2187_v55, %v950_v45  ;;  %v982_v2 = vsub.f32 %v2191_v58, %v950_v45 }
 0x1ea   : > { %v1739_v5 = vpop.eup %1738 }
 0x1eb   : > { %v1741_v15 = vpop.eup %1740  ;;  %v997_v16 = vpack.c.bf16 %v981_v1, %v979_v46  ;;  %v998_v18 = vpack.c.bf16 %v982_v2, %v980_v48  ;;  %v1067_v27 = vunpack.c.l.bf16 %v1739_v5  ;;  %v1069_v28 = vunpack.c.h.bf16 %v1739_v5  ;;  %v1228_v48 = vld [vmem:[%s2343_s6 + $0x20] sm:$0xff] }
 0x1ec   : > { %1199 = vmatprep.mubr.bf16.mxu1 %v1741_v15  ;;  %v1068_v19 = vunpack.c.l.bf16 %v1741_v15  ;;  %v1070_v29 = vunpack.c.h.bf16 %v1741_v15 }
 0x1ed   : > { %v1042_v20 = vmul.bf16 1069105081, %v997_v16  ;;  %v1045_v32 = vmul.bf16 1069105081, %v998_v18  ;;  %v1229_v18 = vld [vmem:[%s2343_s6 + $0x28] sm:$0xff] }
 0x1ee   : > { %v1109_v21 = vadd.f32 %v1068_v19, %v1067_v27  ;;  %v1112_v22 = vadd.f32 %v1070_v29, %v1069_v28 }
 0x1ef   : > { %1746 = vpow.bf16 %v1042_v20  ;;  %1200 = vmatmul.mubr.bf16.gmra.mrb[64].mxu1 %v1739_v5 }
 0x1f0   : > { %1748 = vpow.bf16 %v1045_v32  ;;  %1110 = vadd.xlane.f32.xlu0 %v1109_v21  ;;  %1113 = vadd.xlane.f32.xlu1 %v1112_v22  ;;  %v1230_v22 = vld [vmem:[%s2343_s6 + $0x30] sm:$0xff] }
 0x1f2   : > { %v1743_v50 = vpop.eup %1742 }
 0x1f3   : > { %v1745_v54 = vpop.eup %1744  ;;  %v1071_v55 = vunpack.c.l.bf16 %v1743_v50  ;;  %v1073_v58 = vunpack.c.h.bf16 %v1743_v50 }
 0x1f4   : > { %1207 = vmatprep.mubr.bf16.mxu1 %v1745_v54  ;;  %v1072_v23 = vunpack.c.l.bf16 %v1745_v54  ;;  %v1074_v30 = vunpack.c.h.bf16 %v1745_v54 }
 0x1f6   : > { %v1115_v31 = vadd.f32 %v1072_v23, %v1071_v55  ;;  %v1118_v12 = vadd.f32 %v1074_v30, %v1073_v58  ;;  %v1231_v30 = vld [vmem:[%s2343_s6 + $0x38] sm:$0xff] }
 0x1f7   : > { %1208 = vmatmul.mubr.bf16.gmra.mrb[68].mxu1 %v1743_v50 }
 0x1f8   : > { %1116 = vadd.xlane.f32.xlu0 %v1115_v31  ;;  %1119 = vadd.xlane.f32.xlu1 %v1118_v12 }
 0x1fa   : > { %v1747_v42 = vpop.eup %1746 }
 0x1fb   : > { %v1749_v13 = vpop.eup %1748  ;;  %v1077_v14 = vunpack.c.h.bf16 %v1747_v42  ;;  %v1075_v17 = vunpack.c.l.bf16 %v1747_v42 }
 0x1fc   : > { %1215 = vmatprep.mubr.bf16.mxu1 %v1749_v13  ;;  %v1078_v33 = vunpack.c.h.bf16 %v1749_v13  ;;  %v1076_v38 = vunpack.c.l.bf16 %v1749_v13 }
 0x1fe   : > { %v1124_v35 = vadd.f32 %v1078_v33, %v1077_v14  ;;  %v1121_v44 = vadd.f32 %v1076_v38, %v1075_v17  ;;  %v1232_v38 = vld [vmem:[%s2343_s6 + $0x40] sm:$0xff] }
 0x1ff   : > { %1216 = vmatmul.mubr.bf16.gmra.mrb[72].mxu1 %v1747_v42 }
 0x200   : > { %1125 = vadd.xlane.f32.xlu1 %v1124_v35  ;;  %1122 = vadd.xlane.f32.xlu0 %v1121_v44 }
 0x201   : > { %1496 = vmatprep.mubr.bf16.mxu1 %v1846_v0 }
 0x257   : > { %v1081_v36 = vpop.xlane.xlu0 %1080  ;;  %v1084_v37 = vpop.xlane.xlu1 %1083 }
 0x258   : > { %1750 = vrcp.f32 %v1081_v36 }
 0x259   : > { %1752 = vrcp.f32 %v1084_v37 }
 0x25f   : > { %v1087_v40 = vpop.xlane.xlu0 %1086  ;;  %v1090_v41 = vpop.xlane.xlu1 %1089 }
 0x260   : > { %1754 = vrcp.f32 %v1087_v40 }
 0x261   : > { %1756 = vrcp.f32 %v1090_v41  ;;  %v1233_v41 = vld [vmem:[%s2343_s6 + $0x48] sm:$0xff] }
 0x262   : > { %v1751_v39 = vpop.eup %1750 }
 0x263   : > { %v1256_v52 = vmul.f32 %v1751_v39, %v1224_v51  ;;  %v1753_v53 = vpop.eup %1752 }
 0x264   : > { %v1257_v57 = vmul.f32 %v1753_v53, %v1225_v56 }
 0x265   : > { %v1093_v47 = vpop.xlane.xlu0 %1092  ;;  %v1096_v34 = vpop.xlane.xlu1 %1095 }
 0x266   : > { %1758 = vrcp.f32 %v1093_v47 }
 0x267   : > { %1760 = vrcp.f32 %v1096_v34 }
 0x26a   : > { %v1755_v60 = vpop.eup %1754 }
 0x26b   : > { %v1258_v4 = vmul.f32 %v1755_v60, %v1226_v61  ;;  %v1757_v6 = vpop.eup %1756  ;;  %v1235_v60 = vld [vmem:[%s2343_s6 + $0x58] sm:$0xff] }
 0x26c   : > { %v1259_v43 = vmul.f32 %v1757_v6, %v1227_v8 }
 0x26d   : > { %v1099_v3 = vpop.xlane.xlu0 %1098  ;;  %v1102_v63 = vpop.xlane.xlu1 %1101 }
 0x26e   : > { %1762 = vrcp.f32 %v1099_v3 }
 0x26f   : > { %1764 = vrcp.f32 %v1102_v63 }
 0x270   : > { %v1759_v46 = vpop.eup %1758 }
 0x271   : > { %v1260_v5 = vmul.f32 %v1759_v46, %v1228_v48  ;;  %v1761_v15 = vpop.eup %1760 }
 0x272   : > { %v1261_v20 = vmul.f32 %v1761_v15, %v1229_v18 }
 0x275   : > { %v1105_v2 = vpop.xlane.xlu0 %1104  ;;  %v1108_v29 = vpop.xlane.xlu1 %1107 }
 0x276   : > { %1766 = vrcp.f32 %v1105_v2 }
 0x277   : > { %1768 = vrcp.f32 %v1108_v29  ;;  %v1239_v29 = vld [vmem:[%s2343_s6 + $0x78] sm:$0xff] }
 0x278   : > { %v1763_v21 = vpop.eup %1762 }
 0x279   : > { %v1262_v55 = vmul.f32 %v1763_v21, %v1230_v22  ;;  %v1765_v58 = vpop.eup %1764 }
 0x27a   : > { %v1263_v14 = vmul.f32 %v1765_v58, %v1231_v30 }
 0x27d   : > { %v1111_v54 = vpop.xlane.xlu0 %1110  ;;  %v1114_v13 = vpop.xlane.xlu1 %1113 }
 0x27e   : > { %1770 = vrcp.f32 %v1111_v54 }
 0x27f   : > { %1772 = vrcp.f32 %v1114_v13 }
 0x280   : > { %v1767_v33 = vpop.eup %1766 }
 0x281   : > { %v1264_v36 = vmul.f32 %v1767_v33, %v1232_v38  ;;  %v1769_v37 = vpop.eup %1768 }
 0x282   : > { %v1265_v53 = vmul.f32 %v1769_v37, %v1233_v41 }
 0x285   : > { %v1117_v44 = vpop.xlane.xlu0 %1116 }
 0x286   : > { %1774 = vrcp.f32 %v1117_v44 }
 0x288   : > { %v1771_v56 = vpop.eup %1770 }
 0x29a   : > { %v1161_v49 = vpop.f32.mrb[44].mxu1 }
 0x29b   : > { %v1272_v24 = vmul.f32 %v1256_v52, %v1161_v49  ;;  %v1163_v25 = vpop.f32.mrb[45].mxu1  ;;  %v1120_v52 = vpop.xlane.xlu1 %1119 }
 0x29c   : > { %v1164_v26 = vpop.f32.mrb[46].mxu1  ;;  %1776 = vrcp.f32 %v1120_v52 }
 0x29d   : > { %v1166_v59 = vpop.f32.mrb[47].mxu1  ;;  %1288 = vxpose.xlu0.b32.start [1/16] %v1272_v24, 128  ;;  %v1273_v62 = vmul.f32 %v1257_v57, %v1164_v26  ;;  %v1234_v24 = vld [vmem:[%s2343_s6 + $0x50] sm:$0xff]  ;;  %v1123_v26 = vpop.xlane.xlu0 %1122 }
 0x29e   : > { %v1266_v34 = vmul.f32 %v1771_v56, %v1234_v24  ;;  %v1773_v57 = vpop.eup %1772  ;;  %1778 = vrcp.f32 %v1123_v26  ;;  %v1458_v56 = vld [vmem:[%s2342_s5] sm:$0xf] }
 0x29f   : > { %v1267_v6 = vmul.f32 %v1773_v57, %v1235_v60  ;;  %v1775_v8 = vpop.eup %1774  ;;  %1461 = vperm.xlu1 %1691, %v1458_v56  }
 0x2a1   : > { %1289 = vxpose.xlu0.b32.cont [2/16] %v1273_v62, 128 }
 0x2a2   : > { %v1169_v7 = vpop.f32.mrb[48].mxu1 }
 0x2a3   : > { %v1274_v9 = vmul.f32 %v1258_v4, %v1169_v7  ;;  %v1171_v10 = vpop.f32.mrb[49].mxu1  ;;  %v1126_v4 = vpop.xlane.xlu1 %1125 }
 0x2a4   : > { %v1172_v11 = vpop.f32.mrb[50].mxu1  ;;  %1780 = vrcp.f32 %v1126_v4 }
 0x2a5   : > { %v1174_v45 = vpop.f32.mrb[51].mxu1  ;;  %1290 = vxpose.xlu0.b32.cont [3/16] %v1274_v9, 128  ;;  %v1275_v1 = vmul.f32 %v1259_v43, %v1172_v11  ;;  %v1236_v9 = vld [vmem:[%s2343_s6 + $0x60] sm:$0xff] }
 0x2a6   : > { %v1268_v11 = vmul.f32 %v1775_v8, %v1236_v9  ;;  %v1777_v63 = vpop.eup %1776  ;;  %v1237_v45 = vld [vmem:[%s2343_s6 + $0x68] sm:$0xff] }
 0x2a7   : > { %v1269_v2 = vmul.f32 %v1777_v63, %v1237_v45 }
 0x2a8   : > { %v1779_v15 = vpop.eup %1778 }
 0x2a9   : > { %1291 = vxpose.xlu0.b32.cont [4/16] %v1275_v1, 128 }
 0x2aa   : > { %v1177_v16 = vpop.f32.mrb[52].mxu1 }
 0x2ab   : > { %v1276_v27 = vmul.f32 %v1260_v5, %v1177_v16  ;;  %v1179_v28 = vpop.f32.mrb[53].mxu1  ;;  %v1238_v16 = vld [vmem:[%s2343_s6 + $0x70] sm:$0xff] }
 0x2ac   : > { %v1180_v19 = vpop.f32.mrb[54].mxu1 }
 0x2ad   : > { %v1182_v32 = vpop.f32.mrb[55].mxu1  ;;  %1292 = vxpose.xlu0.b32.cont [5/16] %v1276_v27, 128  ;;  %v1277_v50 = vmul.f32 %v1261_v20, %v1180_v19  ;;  %v1270_v27 = vmul.f32 %v1779_v15, %v1238_v16 }
 0x2ae   : > { %v1781_v28 = vpop.eup %1780 }
 0x2af   : > { %v1271_v22 = vmul.f32 %v1781_v28, %v1239_v29 }
 0x2b1   : > { %1293 = vxpose.xlu0.b32.cont [6/16] %v1277_v50, 128 }
 0x2b2   : > { %v1185_v23 = vpop.f32.mrb[56].mxu1 }
 0x2b3   : > { %v1278_v31 = vmul.f32 %v1262_v55, %v1185_v23  ;;  %v1187_v12 = vpop.f32.mrb[57].mxu1 }
 0x2b4   : > { %v1188_v42 = vpop.f32.mrb[58].mxu1 }
 0x2b5   : > { %v1190_v17 = vpop.f32.mrb[59].mxu1  ;;  %1294 = vxpose.xlu0.b32.cont [7/16] %v1278_v31, 128  ;;  %v1279_v35 = vmul.f32 %v1263_v14, %v1188_v42 }
 0x2b9   : > { %1295 = vxpose.xlu0.b32.cont [8/16] %v1279_v35, 128 }
 0x2ba   : > { %v1193_v40 = vpop.f32.mrb[60].mxu1 }
 0x2bb   : > { %v1280_v39 = vmul.f32 %v1264_v36, %v1193_v40  ;;  %v1195_v51 = vpop.f32.mrb[61].mxu1 }
 0x2bc   : > { %v1196_v47 = vpop.f32.mrb[62].mxu1 }
 0x2bd   : > { %v1198_v49 = vpop.f32.mrb[63].mxu1  ;;  %1296 = vxpose.xlu0.b32.cont [9/16] %v1280_v39, 128  ;;  %v1281_v25 = vmul.f32 %v1265_v53, %v1196_v47 }
 0x2c1   : > { %1297 = vxpose.xlu0.b32.cont [10/16] %v1281_v25, 128 }
 0x2c2   : > { %v1201_v59 = vpop.f32.mrb[64].mxu1 }
 0x2c3   : > { %v1282_v61 = vmul.f32 %v1266_v34, %v1201_v59  ;;  %v1203_v62 = vpop.f32.mrb[65].mxu1 }
 0x2c4   : > { %v1204_v3 = vpop.f32.mrb[66].mxu1 }
 0x2c5   : > { %v1206_v7 = vpop.f32.mrb[67].mxu1  ;;  %1298 = vxpose.xlu0.b32.cont [11/16] %v1282_v61, 128  ;;  %v1283_v10 = vmul.f32 %v1267_v6, %v1204_v3 }
 0x2c9   : > { %1299 = vxpose.xlu0.b32.cont [12/16] %v1283_v10, 128 }
 0x2ca   : > { %v1209_v43 = vpop.f32.mrb[68].mxu1 }
 0x2cb   : > { %v1284_v46 = vmul.f32 %v1268_v11, %v1209_v43  ;;  %v1211_v48 = vpop.f32.mrb[69].mxu1 }
 0x2cc   : > { %v1212_v1 = vpop.f32.mrb[70].mxu1 }
 0x2cd   : > { %v1214_v5 = vpop.f32.mrb[71].mxu1  ;;  %1300 = vxpose.xlu0.b32.cont [13/16] %v1284_v46, 128  ;;  %v1285_v18 = vmul.f32 %v1269_v2, %v1212_v1 }
 0x2d1   : > { %1301 = vxpose.xlu0.b32.cont [14/16] %v1285_v18, 128 }
 0x2d2   : > { %v1217_v19 = vpop.f32.mrb[72].mxu1 }
 0x2d3   : > { %v1286_v20 = vmul.f32 %v1270_v27, %v1217_v19  ;;  %v1219_v32 = vpop.f32.mrb[73].mxu1 }
 0x2d4   : > { %v1220_v21 = vpop.f32.mrb[74].mxu1 }
 0x2d5   : > { %v1222_v50 = vpop.f32.mrb[75].mxu1  ;;  %1302 = vxpose.xlu0.b32.cont [15/16] %v1286_v20, 128  ;;  %v1287_v54 = vmul.f32 %v1271_v22, %v1220_v21 }
 0x2d9   : > { %1303 = vxpose.xlu0.b32.end [16/16] %v1287_v54, 128 }
 0x302   : > { %1692 = vset.pattern.permute.xlu0 %v1846_v0 }
 0x31d   : > { %v1304_v55 = vpop.trf.xlu0 }
 0x321   : > { %v1305_v58 = vpop.trf.xlu0 }
 0x322   : > { %v1320_v23 = vpack.c.bf16 %v1305_v58, %v1304_v55 }
 0x324   : > { %1361 = vmatmul.mubr.bf16.vlgmr.msra.gmra.mrb[52].mxu0 %v1320_v23 }
 0x325   : > { %v1306_v30 = vpop.trf.xlu0  ;;  %1370 = vmatprep.mubr.bf16.mxu0 %v1846_v0 }
 0x329   : > { %v1307_v31 = vpop.trf.xlu0 }
 0x32a   : > { %v1321_v12 = vpack.c.bf16 %v1307_v31, %v1306_v30 }
 0x32c   : > { %1371 = vmatmul.mubr.bf16.gmra.mrb[56].mxu0 %v1321_v12 }
 0x32d   : > { %v1308_v42 = vpop.trf.xlu0  ;;  %1380 = vmatprep.mubr.bf16.mxu0 %v1846_v0 }
 0x331   : > { %v1309_v13 = vpop.trf.xlu0 }
 0x332   : > { %v1322_v14 = vpack.c.bf16 %v1309_v13, %v1308_v42 }
 0x334   : > { %1381 = vmatmul.mubr.bf16.gmra.mrb[60].mxu0 %v1322_v14 }
 0x335   : > { %v1310_v17 = vpop.trf.xlu0  ;;  %1390 = vmatprep.mubr.bf16.mxu0 %v1846_v0 }
 0x339   : > { %v1311_v33 = vpop.trf.xlu0 }
 0x33a   : > { %v1323_v38 = vpack.c.bf16 %v1311_v33, %v1310_v17  ;;  %v1441_v17 = vld [vmem:[%s2341_s4] sm:$0x3]  ;;  %v1462_v33 = vpop.permute.xlu1 %1461 }
 0x33c   : > { %1391 = vmatmul.mubr.bf16.gmra.mrb[64].mxu0 %v1323_v38 }
 0x33d   : > { %v1312_v35 = vpop.trf.xlu0  ;;  %1400 = vmatprep.mubr.bf16.mxu0 %v1846_v0 }
 0x341   : > { %v1313_v44 = vpop.trf.xlu0 }
 0x342   : > { %v1324_v36 = vpack.c.bf16 %v1313_v44, %v1312_v35 }
 0x344   : > { %1401 = vmatmul.mubr.bf16.gmra.mrb[68].mxu0 %v1324_v36 }
 0x345   : > { %v1314_v37 = vpop.trf.xlu0  ;;  %1410 = vmatprep.mubr.bf16.mxu0 %v1846_v0 }
 0x349   : > { %v1315_v40 = vpop.trf.xlu0 }
 0x34a   : > { %v1325_v41 = vpack.c.bf16 %v1315_v40, %v1314_v37 }
 0x34c   : > { %1411 = vmatmul.mubr.bf16.gmra.mrb[72].mxu0 %v1325_v41 }
 0x34d   : > { %v1316_v39 = vpop.trf.xlu0  ;;  %1420 = vmatprep.mubr.bf16.mxu0 %v1846_v0 }
 0x351   : > { %v1317_v51 = vpop.trf.xlu0 }
 0x352   : > { %v1326_v47 = vpack.c.bf16 %v1317_v51, %v1316_v39 }
 0x354   : > { %1421 = vmatmul.mubr.bf16.gmra.mrb[76].mxu0 %v1326_v47 }
 0x355   : > { %v1318_v52 = vpop.trf.xlu0  ;;  %1430 = vmatprep.mubr.bf16.mxu0 %v1846_v0 }
 0x359   : > { %v1319_v53 = vpop.trf.xlu0 }
 0x35a   : > { %v1327_v49 = vpack.c.bf16 %v1319_v53, %v1318_v52 }
 0x35c   : > { %1431 = vmatmul.mubr.bf16.gmra.mrb[80].mxu0 %v1327_v49 }
 0x3f7   : > { %v1362_v24 = vpop.f32.mrb[52].mxu0 }
 0x3f8   : > { %v1364_v25 = vpop.f32.mrb[53].mxu0 }
 0x3f9   : > { %v1366_v26 = vpop.f32.mrb[54].mxu0 }
 0x3fa   : > { %v1442_v34 = vpack.c.bf16 %v1366_v26, %v1362_v24  ;;  %v1368_v57 = vpop.f32.mrb[55].mxu0 }
 0x3fb   : > { %v1443_v59 = vpack.c.bf16 %v1368_v57, %v1364_v25 }
 0x3fd   : > { %1464 = vmatprep.subr.bf16.mxu1 %v1443_v59 }
 0x3fe   : > { %1465 = vmatpush1.bf16.msra.mxu1 %v1442_v34 }
 0x3ff   : > { %v1372_v60 = vpop.f32.mrb[56].mxu0 }
 0x400   : > { %v1374_v61 = vpop.f32.mrb[57].mxu0 }
 0x401   : > { %v1376_v62 = vpop.f32.mrb[58].mxu0 }
 0x402   : > { %v1444_v0 = vpack.c.bf16 %v1376_v62, %v1372_v60  ;;  %v1378_v3 = vpop.f32.mrb[59].mxu0 }
 0x403   : > { %v1445_v4 = vpack.c.bf16 %v1378_v3, %v1374_v61 }
 0x405   : > { %1466 = vmatprep.subr.bf16.mxu1 %v1445_v4 }
 0x406   : > { %1467 = vmatpush1.bf16.msra.mxu1 %v1444_v0 }
 0x407   : > { %v1382_v6 = vpop.f32.mrb[60].mxu0 }
 0x408   : > { %v1384_v7 = vpop.f32.mrb[61].mxu0 }
 0x409   : > { %v1386_v8 = vpop.f32.mrb[62].mxu0 }
 0x40a   : > { %v1446_v9 = vpack.c.bf16 %v1386_v8, %v1382_v6  ;;  %v1388_v10 = vpop.f32.mrb[63].mxu0 }
 0x40b   : > { %v1447_v11 = vpack.c.bf16 %v1388_v10, %v1384_v7 }
 0x40d   : > { %1468 = vmatprep.subr.bf16.mxu1 %v1447_v11 }
 0x40e   : > { %1469 = vmatpush1.bf16.msra.mxu1 %v1446_v9 }
 0x40f   : > { %v1392_v63 = vpop.f32.mrb[64].mxu0 }
 0x410   : > { %v1394_v43 = vpop.f32.mrb[65].mxu0 }
 0x411   : > { %v1396_v45 = vpop.f32.mrb[66].mxu0 }
 0x412   : > { %v1448_v46 = vpack.c.bf16 %v1396_v45, %v1392_v63  ;;  %v1398_v48 = vpop.f32.mrb[67].mxu0 }
 0x413   : > { %v1449_v1 = vpack.c.bf16 %v1398_v48, %v1394_v43 }
 0x415   : > { %1470 = vmatprep.subr.bf16.mxu1 %v1449_v1 }
 0x416   : > { %1471 = vmatpush1.bf16.msra.mxu1 %v1448_v46 }
 0x417   : > { %v1402_v2 = vpop.f32.mrb[68].mxu0 }
 0x418   : > { %v1404_v5 = vpop.f32.mrb[69].mxu0 }
 0x419   : > { %v1406_v15 = vpop.f32.mrb[70].mxu0 }
 0x41a   : > { %v1450_v16 = vpack.c.bf16 %v1406_v15, %v1402_v2  ;;  %v1408_v18 = vpop.f32.mrb[71].mxu0 }
 0x41b   : > { %v1451_v27 = vpack.c.bf16 %v1408_v18, %v1404_v5 }
 0x41d   : > { %1472 = vmatprep.subr.bf16.mxu1 %v1451_v27 }
 0x41e   : > { %1473 = vmatpush1.bf16.msra.mxu1 %v1450_v16 }
 0x41f   : > { %v1412_v28 = vpop.f32.mrb[72].mxu0 }
 0x420   : > { %v1414_v19 = vpop.f32.mrb[73].mxu0 }
 0x421   : > { %v1416_v29 = vpop.f32.mrb[74].mxu0 }
 0x422   : > { %v1452_v20 = vpack.c.bf16 %v1416_v29, %v1412_v28  ;;  %v1418_v32 = vpop.f32.mrb[75].mxu0 }
 0x423   : > { %v1453_v21 = vpack.c.bf16 %v1418_v32, %v1414_v19 }
 0x425   : > { %1474 = vmatprep.subr.bf16.mxu1 %v1453_v21 }
 0x426   : > { %1475 = vmatpush1.bf16.msra.mxu1 %v1452_v20 }
 0x427   : > { %v1422_v22 = vpop.f32.mrb[76].mxu0 }
 0x428   : > { %v1424_v50 = vpop.f32.mrb[77].mxu0 }
 0x429   : > { %v1426_v54 = vpop.f32.mrb[78].mxu0 }
 0x42a   : > { %v1454_v55 = vpack.c.bf16 %v1426_v54, %v1422_v22  ;;  %v1428_v58 = vpop.f32.mrb[79].mxu0 }
 0x42b   : > { %v1455_v23 = vpack.c.bf16 %v1428_v58, %v1424_v50 }
 0x42d   : > { %1476 = vmatprep.subr.bf16.mxu1 %v1455_v23 }
 0x42e   : > { %1477 = vmatpush1.bf16.msra.mxu1 %v1454_v55 }
 0x42f   : > { %v1432_v30 = vpop.f32.mrb[80].mxu0 }
 0x430   : > { %v1434_v31 = vpop.f32.mrb[81].mxu0 }
 0x431   : > { %v1436_v12 = vpop.f32.mrb[82].mxu0 }
 0x432   : > { %v1456_v42 = vpack.c.bf16 %v1436_v12, %v1432_v30  ;;  %v1438_v13 = vpop.f32.mrb[83].mxu0 }
 0x433   : > { %v1457_v14 = vpack.c.bf16 %v1438_v13, %v1434_v31 }
 0x435   : > { %1478 = vmatprep.subr.bf16.mxu1 %v1457_v14 }
 0x436   : > { %1479 = vmatpush1.bf16.msra.mxu1 %v1456_v42 }
 0x439   : > { %1497 = vmatmul.mubr.bf16.vlgmr.msra.gmra.mrb[76].mxu1 %v1441_v17 }
 0x50c   : > { %v1498_v38 = vpop.f32.mrb[76].mxu1 }
 0x50d   : > { %v1500_v35 = vpop.f32.mrb[77].mxu1  ;;  %v1499_v44 = vadd.f32 %v1498_v38, %v1462_v33 }
 0x50e   : > { %v1502_v36 = vpop.f32.mrb[78].mxu1  ;;  %v1501_v37 = vadd.f32 %v1500_v35, %v1462_v33 }
 0x50f   : > { %v1503_v40 = vpop.f32.mrb[79].mxu1 }
 0x510   : > { %v1507_v41 = vcombine.low %v1499_v44, %v1501_v37 }
 0x512   : > { %1509 = vst [vmem:[%s271_s21] sm:$0xff] %v1507_v41 }
 0x513   : > { %1795 = shalt.err (!%p1792_p3)
}
 0x514   : > { %s1796_s16 = scalar_lea.hbm %s2295_s8, 128  ;;  %s1800_s19 = scalar_lea.hbm %s2344_s7, 256 }
 0x515   : > { %p1797_p4 = scmp.ne.s32.totalorder %s2295_s8, %s1796_s16  ;;  %p1801_p9 = scmp.lt.u32.totalorder %s2295_s8, %s2344_s7 }
 0x516   : > { %p1802_p10 = scmp.lt.u32.totalorder %s1800_s19, %s1796_s16  ;;  %p1804_p12 = scmp.lt.u32.totalorder %s1796_s16, %s2295_s8 }
 0x517   : > { %p1798_p7 = pnand %p1797_p4, %p1926_p5 }
 0x518   : > { %p1803_p11 = por %p1802_p10, %p1801_p9 }
 0x519   : > { %p1799_p8 = pneg %p1798_p7 }
 0x51a   : > { %p1805_p13 = por %p1804_p12, %p1803_p11 }
 0x51c   : > { %p1806_p0 = pnand %p1805_p13, %p1799_p8 }
 0x51e   : > { %1809 = shalt.err (!%p1806_p0)
}
 0x51f   : > { %1651 = dma.vmem_to_hbm [thread:$0]  (%p1926_p5), %s2297_s22, 128, %s2295_s8, %s1511_s9  }
 0x520 PF: > { %p1657_p1 = scmp.ge.s32.totalorder %s1844_s27, 2  ;;  %s1537_s23 = sand.u32 1, %s1832_s24  }
 0x521   : > { %s1538_s29 = scalar_lea.sflag [#allocation3], %s1537_s23 }
 0x522   : > { %p1654_p2 = pnand %p1657_p1, %p1930_p6 }
 0x524   : > { %1827 = dma.done.wait (!%p1654_p2), %s1538_s29, 128  }
 0x525   : > { %1829 = vsyncadd (!%p1654_p2), %s1538_s29, 4294967168  ;;  %p17_p3 = scmp.ge.s32.totalorder %s1913_s30, 4   ;;  %s2347_s24 = smov %s1836_s25 }
 0x526   : > { %s2348_s25 = smov %s1840_s26  ;;  %s2349_s26 = smov %s1924_s10 }
 0x527   : > { %s2350_s27 = smov %s1913_s30  ;;  %19 = sbr.rel (!%p17_p3) target bundleno = 3 (0x3), region = 83 }
 0x52e   :  { %1543 = vsyncpa [#allocation3], 1 }
 0x52f   :  { %1545 = vsyncpa [#allocation3 + $0x1], 1 }

</bundles_post_ra>
